<compile_context>
chip_gen: v6e
topology: v6e:2x2x1
jax: 0.10.0
libtpu: 0.0.40
codegen_flags: <defaults>
</compile_context>

<pallas_src>
import jax
import jax.numpy as jnp
from jax import lax
from jax.experimental import pallas as pl
from jax.experimental.pallas import tpu as pltpu


LANE = 128  # one full lane tile / channel group


# ---------------------------------------------------------------------------
# Fused kernel: one 128-channel output group per grid step
#   groups 0..NGC-1 : 1x1-conv slab (MXU) -> training-mode BN -> store
#   last group      : concat branch      -> training-mode BN -> store
# ---------------------------------------------------------------------------
def _conv_cat_bn_kernel(x_ref, xr_ref, w_ref, g_ref, b_ref, o_ref):
    """x_ref : (M, Cin)   bf16  pooled conv input (resident across all steps)
       xr_ref: (M, 128)   bf16  concat branch, channel-padded (resident)
       w_ref : (Cin, 128) bf16  1x1-conv weight slab (avg-pool 1/4 folded in)
       g_ref, b_ref: (1, 128) f32  BN affine slab for this group
       o_ref : (M, 128)   f32   lane-dense output slab
    """
    j = pl.program_id(0)
    last = pl.num_programs(0) - 1
    eps = 1e-5

    def batchnorm(z):
        # training-mode BN: per-channel mean / biased variance over all pixels
        mean = jnp.mean(z, axis=0, keepdims=True)
        var = jnp.mean(jnp.square(z - mean), axis=0, keepdims=True)
        return (z - mean) * lax.rsqrt(var + eps) * g_ref[...] + b_ref[...]

    @pl.when(j < last)                            # conv-output channel groups
    def _():
        y = jnp.dot(x_ref[...], w_ref[...], preferred_element_type=jnp.float32)
        o_ref[...] = batchnorm(y)

    @pl.when(j == last)                           # concat-branch channel group
    def _():
        o_ref[...] = batchnorm(xr_ref[...].astype(jnp.float32))


# ---------------------------------------------------------------------------
# Full forward (layout glue in plain JAX, hot path fused in one Pallas kernel)
# ---------------------------------------------------------------------------
def model_forward(x138, x147, w_conv, gamma, beta):
    # x138: (N, 768, H, W) NCHW ; x147: (N, 48, H//2, W//2) NCHW
    N, Cin, H, W = x138.shape
    Cout = w_conv.shape[1]
    Ccat = x147.shape[1]
    Hp, Wp = H // 2, W // 2
    M = N * Hp * Wp
    NGC = Cout // LANE             # 3 conv-output channel groups
    C2P = LANE                     # concat group padded to one full lane tile
    CTOT = Cout + Ccat             # 432 real output channels
    CPAD = Cout + C2P              # 512 lane-dense kernel output width

    # Pool the 768-ch INPUT first (1x1 conv commutes with 2x2 avg-pool).
    # Cast to bf16 BEFORE any layout op (halves transpose bytes); accumulate
    # the 4 taps in f32 (free inside the fusion); fold the 1/4 into the weight.
    xb = x138.astype(jnp.bfloat16)
    xs = xb.reshape(N, Cin, Hp, 2, Wp, 2).sum(axis=(3, 5), dtype=jnp.float32)
    pooled = jnp.transpose(xs.astype(jnp.bfloat16), (0, 2, 3, 1)).reshape(M, Cin)

    # Concat branch -> channels-last, bf16, padded to a full 128-lane group.
    xr = jnp.transpose(x147, (0, 2, 3, 1)).reshape(M, Ccat).astype(jnp.bfloat16)
    xr = jnp.pad(xr, ((0, 0), (0, C2P - Ccat)))

    wb = (w_conv * 0.25).astype(jnp.bfloat16)           # fold avg-pool 1/4

    gpad = jnp.pad(gamma, (0, C2P - Ccat)).reshape(1, CPAD).astype(jnp.float32)
    bpad = jnp.pad(beta, (0, C2P - Ccat)).reshape(1, CPAD).astype(jnp.float32)

    out_flat = pl.pallas_call(
        _conv_cat_bn_kernel,
        out_shape=jax.ShapeDtypeStruct((M, CPAD), jnp.float32),
        grid=(NGC + 1,),
        in_specs=[
            pl.BlockSpec((M, Cin), lambda j: (0, 0)),        # pooled, resident
            pl.BlockSpec((M, C2P), lambda j: (0, 0)),        # concat, resident
            pl.BlockSpec((Cin, LANE),
                         lambda j: (0, jnp.minimum(j, NGC - 1))),  # weight slab
            pl.BlockSpec((1, LANE), lambda j: (0, j)),       # gamma slab
            pl.BlockSpec((1, LANE), lambda j: (0, j)),       # beta slab
        ],
        out_specs=pl.BlockSpec((M, LANE), lambda j: (0, j)),
        compiler_params=pltpu.CompilerParams(
            dimension_semantics=("parallel",)),
    )(pooled, xr, wb, gpad, bpad)

    out = out_flat[:, :CTOT].reshape(N, Hp, Wp, CTOT)
    return jnp.transpose(out, (0, 3, 1, 2))                  # back to NCHW


# ---------------------------------------------------------------------------
if __name__ == "__main__":
    key = jax.random.PRNGKey(0)
    k1, k2, k3, k4, k5 = jax.random.split(key, 5)

    # SMALL shapes consistent with the module: channel counts fixed by the
    # module (768 -> 384 conv, +48 cat, 432 BN); spatial reduced 28 -> 16.
    N, H, W = 2, 16, 16
    Cin, Cout, Ccat = 768, 384, 48
    Hp, Wp = H // 2, W // 2

    x138 = jax.random.normal(k1, (N, Cin, H, W), jnp.float32)
    x147 = jax.random.normal(k2, (N, Ccat, Hp, Wp), jnp.float32)

    # Conv2d(768, 384, 1, bias=False) weight (Cout,Cin,1,1) stored as (Cin,Cout)
    w_conv = 0.02 * jax.random.normal(k3, (Cin, Cout), jnp.float32)
    # BatchNorm2d(432) affine params (deterministic, non-trivial)
    gamma = 1.0 + 0.1 * jax.random.normal(k4, (Cout + Ccat,), jnp.float32)
    beta = 0.1 * jax.random.normal(k5, (Cout + Ccat,), jnp.float32)

    out = jax.jit(model_forward)(x138, x147, w_conv, gamma, beta)
    out = jax.block_until_ready(out)

    # pure-JAX f32 reference for sanity checking
    def reference(x138, x147, w, g, b):
        y = jnp.einsum('nchw,cd->ndhw', x138, w)
        y = y.reshape(N, Cout, Hp, 2, Wp, 2).mean(axis=(3, 5))
        z = jnp.concatenate([y, x147], axis=1)
        mean = z.mean(axis=(0, 2, 3), keepdims=True)
        var = jnp.square(z - mean).mean(axis=(0, 2, 3), keepdims=True)
        zn = (z - mean) * lax.rsqrt(var + 1e-5)
        return zn * g[None, :, None, None] + b[None, :, None, None]

    expected = reference(x138, x147, w_conv, gamma, beta)
    assert out.shape == (N, Cout + Ccat, Hp, Wp), out.shape
    # kernel matmul / inputs run with bf16 operands (f32 accumulation) ->
    # slightly looser tolerance against the all-f32 reference
    err = float(jnp.max(jnp.abs(out - expected)))
    assert jnp.allclose(out, expected, atol=2.5e-2, rtol=2.5e-2), err
    print("KERNEL_OK")
</pallas_src>

<mosaic_0001>
module attributes {stable_mosaic.version = 11 : i64} {
  func.func @_conv_cat_bn_kernel(%arg0: i32, %arg1: memref<128x768xbf16, #tpu.memory_space<vmem>>, %arg2: memref<128x128xbf16, #tpu.memory_space<vmem>>, %arg3: memref<768x128xbf16, #tpu.memory_space<vmem>>, %arg4: memref<1x128xf32, #tpu.memory_space<vmem>>, %arg5: memref<1x128xf32, #tpu.memory_space<vmem>>, %arg6: memref<128x128xf32, #tpu.memory_space<vmem>>) attributes {dimension_semantics = [#tpu.dimension_semantics<parallel>], iteration_bounds = array<i64: 4>, scalar_prefetch = 0 : i64, scratch_operands = 0 : i64, tpu.core_type = #tpu.core_type<tc>, window_params = [{pipeline_mode = #tpu.pipeline_mode<synchronous>, transform_indices = @transform_0, window_bounds = array<i64: 128, 768>}, {pipeline_mode = #tpu.pipeline_mode<synchronous>, transform_indices = @transform_1, window_bounds = array<i64: 128, 128>}, {transform_indices = @transform_2, window_bounds = array<i64: 768, 128>}, {transform_indices = @transform_3, window_bounds = array<i64: 1, 128>}, {transform_indices = @transform_4, window_bounds = array<i64: 1, 128>}, {transform_indices = @transform_5, window_bounds = array<i64: 128, 128>}]} {
    %c3_i32 = arith.constant 3 : i32
    %0 = arith.cmpi slt, %arg0, %c3_i32 : i32
    %1 = arith.extui %0 : i1 to i32
    %c0_i32 = arith.constant 0 : i32
    %2 = arith.cmpi ne, %1, %c0_i32 : i32
    scf.if %2 {
      %c0 = arith.constant 0 : index
      %c0_2 = arith.constant 0 : index
      %6 = vector.load %arg1[%c0, %c0_2] : memref<128x768xbf16, #tpu.memory_space<vmem>>, vector<128x768xbf16>
      %c0_3 = arith.constant 0 : index
      %c0_4 = arith.constant 0 : index
      %7 = vector.load %arg3[%c0_3, %c0_4] : memref<768x128xbf16, #tpu.memory_space<vmem>>, vector<768x128xbf16>
      %cst = arith.constant dense<0.000000e+00> : vector<128x128xf32>
      %8 = tpu.matmul %6, %7, %cst {dimension_numbers = #tpu.dot_dimension_numbers<[1], [0], [0], [1], [0, 0, 1, 1], [], []>} : vector<128x768xbf16>, vector<768x128xbf16>, vector<128x128xf32> -> vector<128x128xf32>
      %cst_5 = arith.constant dense<0.000000e+00> : vector<128xf32>
      %9 = vector.multi_reduction <add>, %8, %cst_5 [0] : vector<128x128xf32> to vector<128xf32>
      %10 = vector.shape_cast %9 : vector<128xf32> to vector<1x128xf32>
      %cst_6 = arith.constant 1.280000e+02 : f32
      %11 = vector.broadcast %cst_6 : f32 to vector<1x128xf32>
      %12 = arith.divf %10, %11 : vector<1x128xf32>
      %13 = vector.broadcast %12 : vector<1x128xf32> to vector<128x128xf32>
      %14 = arith.subf %8, %13 : vector<128x128xf32>
      %15 = arith.mulf %14, %14 : vector<128x128xf32>
      %cst_7 = arith.constant dense<0.000000e+00> : vector<128xf32>
      %16 = vector.multi_reduction <add>, %15, %cst_7 [0] : vector<128x128xf32> to vector<128xf32>
      %17 = vector.shape_cast %16 : vector<128xf32> to vector<1x128xf32>
      %cst_8 = arith.constant 1.280000e+02 : f32
      %18 = vector.broadcast %cst_8 : f32 to vector<1x128xf32>
      %19 = arith.divf %17, %18 : vector<1x128xf32>
      %20 = vector.broadcast %12 : vector<1x128xf32> to vector<128x128xf32>
      %21 = arith.subf %8, %20 : vector<128x128xf32>
      %cst_9 = arith.constant 9.99999974E-6 : f32
      %22 = vector.broadcast %cst_9 : f32 to vector<1x128xf32>
      %23 = arith.addf %19, %22 : vector<1x128xf32>
      %24 = math.rsqrt %23 : vector<1x128xf32>
      %25 = vector.broadcast %24 : vector<1x128xf32> to vector<128x128xf32>
      %26 = arith.mulf %21, %25 : vector<128x128xf32>
      %c0_10 = arith.constant 0 : index
      %c0_11 = arith.constant 0 : index
      %27 = vector.load %arg4[%c0_10, %c0_11] : memref<1x128xf32, #tpu.memory_space<vmem>>, vector<1x128xf32>
      %28 = vector.broadcast %27 : vector<1x128xf32> to vector<128x128xf32>
      %29 = arith.mulf %26, %28 : vector<128x128xf32>
      %c0_12 = arith.constant 0 : index
      %c0_13 = arith.constant 0 : index
      %30 = vector.load %arg5[%c0_12, %c0_13] : memref<1x128xf32, #tpu.memory_space<vmem>>, vector<1x128xf32>
      %31 = vector.broadcast %30 : vector<1x128xf32> to vector<128x128xf32>
      %32 = arith.addf %29, %31 : vector<128x128xf32>
      %c0_14 = arith.constant 0 : index
      %c0_15 = arith.constant 0 : index
      %33 = vector.load %arg6[%c0_14, %c0_15] : memref<128x128xf32, #tpu.memory_space<vmem>>, vector<128x128xf32>
      tpu.vector_store %arg6[%c0_14, %c0_15], %32 {strides = array<i32>} : memref<128x128xf32, #tpu.memory_space<vmem>>, vector<128x128xf32>,
    } else {
    }
    %c3_i32_0 = arith.constant 3 : i32
    %3 = arith.cmpi eq, %arg0, %c3_i32_0 : i32
    %4 = arith.extui %3 : i1 to i32
    %c0_i32_1 = arith.constant 0 : i32
    %5 = arith.cmpi ne, %4, %c0_i32_1 : i32
    scf.if %5 {
      %c0 = arith.constant 0 : index
      %c0_2 = arith.constant 0 : index
      %6 = vector.load %arg2[%c0, %c0_2] : memref<128x128xbf16, #tpu.memory_space<vmem>>, vector<128x128xbf16>
      %7 = arith.extf %6 : vector<128x128xbf16> to vector<128x128xf32>
      %cst = arith.constant dense<0.000000e+00> : vector<128xf32>
      %8 = vector.multi_reduction <add>, %7, %cst [0] : vector<128x128xf32> to vector<128xf32>
      %9 = vector.shape_cast %8 : vector<128xf32> to vector<1x128xf32>
      %cst_3 = arith.constant 1.280000e+02 : f32
      %10 = vector.broadcast %cst_3 : f32 to vector<1x128xf32>
      %11 = arith.divf %9, %10 : vector<1x128xf32>
      %12 = vector.broadcast %11 : vector<1x128xf32> to vector<128x128xf32>
      %13 = arith.subf %7, %12 : vector<128x128xf32>
      %14 = arith.mulf %13, %13 : vector<128x128xf32>
      %cst_4 = arith.constant dense<0.000000e+00> : vector<128xf32>
      %15 = vector.multi_reduction <add>, %14, %cst_4 [0] : vector<128x128xf32> to vector<128xf32>
      %16 = vector.shape_cast %15 : vector<128xf32> to vector<1x128xf32>
      %cst_5 = arith.constant 1.280000e+02 : f32
      %17 = vector.broadcast %cst_5 : f32 to vector<1x128xf32>
      %18 = arith.divf %16, %17 : vector<1x128xf32>
      %19 = vector.broadcast %11 : vector<1x128xf32> to vector<128x128xf32>
      %20 = arith.subf %7, %19 : vector<128x128xf32>
      %cst_6 = arith.constant 9.99999974E-6 : f32
      %21 = vector.broadcast %cst_6 : f32 to vector<1x128xf32>
      %22 = arith.addf %18, %21 : vector<1x128xf32>
      %23 = math.rsqrt %22 : vector<1x128xf32>
      %24 = vector.broadcast %23 : vector<1x128xf32> to vector<128x128xf32>
      %25 = arith.mulf %20, %24 : vector<128x128xf32>
      %c0_7 = arith.constant 0 : index
      %c0_8 = arith.constant 0 : index
      %26 = vector.load %arg4[%c0_7, %c0_8] : memref<1x128xf32, #tpu.memory_space<vmem>>, vector<1x128xf32>
      %27 = vector.broadcast %26 : vector<1x128xf32> to vector<128x128xf32>
      %28 = arith.mulf %25, %27 : vector<128x128xf32>
      %c0_9 = arith.constant 0 : index
      %c0_10 = arith.constant 0 : index
      %29 = vector.load %arg5[%c0_9, %c0_10] : memref<1x128xf32, #tpu.memory_space<vmem>>, vector<1x128xf32>
      %30 = vector.broadcast %29 : vector<1x128xf32> to vector<128x128xf32>
      %31 = arith.addf %28, %30 : vector<128x128xf32>
      %c0_11 = arith.constant 0 : index
      %c0_12 = arith.constant 0 : index
      %32 = vector.load %arg6[%c0_11, %c0_12] : memref<128x128xf32, #tpu.memory_space<vmem>>, vector<128x128xf32>
      tpu.vector_store %arg6[%c0_11, %c0_12], %31 {strides = array<i32>} : memref<128x128xf32, #tpu.memory_space<vmem>>, vector<128x128xf32>,
    } else {
    }
    return
  }
  func.func @transform_0(%arg0: i32) -> (i32, i32) {
    %c0_i32 = arith.constant 0 : i32
    %c0_i32_0 = arith.constant 0 : i32
    %c0_i32_1 = arith.constant 0 : i32
    return %c0_i32, %c0_i32_0 : i32, i32
  }
  func.func @transform_1(%arg0: i32) -> (i32, i32) {
    %c0_i32 = arith.constant 0 : i32
    %c0_i32_0 = arith.constant 0 : i32
    %c0_i32_1 = arith.constant 0 : i32
    return %c0_i32, %c0_i32_0 : i32, i32
  }
  func.func @transform_2(%arg0: i32) -> (i32, i32) {
    %c2_i32 = arith.constant 2 : i32
    %0 = arith.minsi %arg0, %c2_i32 : i32
    %c0_i32 = arith.constant 0 : i32
    %c0_i32_0 = arith.constant 0 : i32
    return %c0_i32, %0 : i32, i32
  }
  func.func @transform_3(%arg0: i32) -> (i32, i32) {
    %c0_i32 = arith.constant 0 : i32
    %c0_i32_0 = arith.constant 0 : i32
    return %c0_i32, %arg0 : i32, i32
  }
  func.func @transform_4(%arg0: i32) -> (i32, i32) {
    %c0_i32 = arith.constant 0 : i32
    %c0_i32_0 = arith.constant 0 : i32
    return %c0_i32, %arg0 : i32, i32
  }
  func.func @transform_5(%arg0: i32) -> (i32, i32) {
    %c0_i32 = arith.constant 0 : i32
    %c0_i32_0 = arith.constant 0 : i32
    return %c0_i32, %arg0 : i32, i32
  }
}

</mosaic_0001>

<bundles_post_ra>
// kernel: model_forward.1
= control target key start
LH: loop header
LB: loop body
LE: loop exit
PB: predicated region body
PF: predicated region fallthrough
CT: control target
= control target key end

     0   :  { %10 = vsyncpa [#allocation4], 0  ;;  %s3491_s0 = inlined_call_operand.vmem [shape: bf16[128,768], index: 0, kind: input, shape index: {}]   ;;  %s3492_s1 = inlined_call_operand.vmem [shape: bf16[128,128], index: 1, kind: input, shape index: {}]   ;;  %s3493_s2 = inlined_call_operand.vmem [shape: bf16[768,384], index: 2, kind: input, shape index: {}]   ;;  %s3494_s3 = inlined_call_operand.vmem [shape: f32[1,512], index: 3, kind: input, shape index: {}]   ;;  %s3495_s4 = inlined_call_operand.vmem [shape: f32[1,512], index: 4, kind: input, shape index: {}]   ;;  %s3496_s5 = inlined_call_operand.hbm [shape: f32[128,512], index: 5, kind: output, shape index: {}]  }
   0x1   :  { %12 = vsyncpa [#allocation4 + $0x1], 0  ;;  %s2754_s18 = smov 0   ;;  %s2756_s19 = smov 0  }
   0x2   :  { %s2758_s20 = smov 0   ;;  %s2760_s21 = smov 0  }
   0x3   :  { %s2762_s22 = smov 0   ;;  %s2764_s23 = smov 0  }
   0x4 LB: > { %s2785_s24 = sadd.s32 4294967295, %s2718_s23   ;;  %s2099_s25 = sadd.s32 4294967294, %s2718_s23   ;;  %s2718_s23 = sphi %s2764_s23, %s3504_s23   ;;  %s2714_s22 = sphi %s2762_s22, %s3503_s22   ;;  %s2710_s21 = sphi %s2760_s21, %s3502_s21   ;;  %s2706_s20 = sphi %s2758_s20, %s3501_s20   ;;  %s2702_s19 = sphi %s2756_s19, %s3500_s19   ;;  %s2698_s18 = sphi %s2754_s18, %s3499_s18  }
   0x5   : > { %s2789_s26 = sadd.s32 1, %s2718_s23   ;;  %p64_p0 = scmp.lt.s32.totalorder %s2718_s23, 2 }
   0x6   : > { %p66_p1 = scmp.lt.s32.totalorder %s2789_s26, 2  ;;  %s71_s27 = sadd.s32 1, %s2714_s22 }
   0x7   : > { %s65_s28 = scalar_select %p64_p0, %s2718_s23, 2 }
   0x8   : > { %s67_s29 = scalar_select %p66_p1, %s2789_s26, 2 }
   0x9   : > { %p78_p2 = scmp.ne.s32.totalorder %s2714_s22, %s2710_s21  ;;  %p79_p3 = scmp.eq.s32.totalorder %s2718_s23, 0 }
   0xa   : > { %s68_s30 = ssub.s32 %s65_s28, %s67_s29  ;;  %s146_s6 = ssub.s32 %s2718_s23, %s2789_s26 }
   0xb   : > { %p69_p4 = scmp.eq.s32.totalorder %s68_s30, 0  ;;  %p80_p5 = por %p79_p3, %p78_p2 }
   0xc   : > { %p147_p6 = scmp.eq.s32.totalorder %s146_s6, 0  ;;  %s149_s7 = sadd.s32 1, %s2706_s20 }
   0xd   : > { %s2803_s8 = scalar_select %p69_p4, %s2714_s22, %s71_s27  }
   0xe   : > { %s2806_s9 = scalar_select %p147_p6, %s2706_s20, %s149_s7  }
   0xf   : > { %p159_p7 = scmp.ne.s32.totalorder %s2706_s20, %s2702_s19  ;;  %p160_p8 = scmp.eq.s32.totalorder %s2785_s24, 3 }
  0x10   : > { %p165_p9 = scmp.ne.s32.totalorder %s2702_s19, %s2698_s18  ;;  %p166_p10 = scmp.eq.s32.totalorder %s2099_s25, 3 }
  0x11   : > { %p2813_p11 = por %p160_p8, %p159_p7  ;;  %p2101_p13 = scmp.ge.s32.totalorder %s2718_s23, 4 }
  0x12   : > { %p2817_p12 = por %p166_p10, %p165_p9 }
  0x13   : > { %188 = sbr.rel (%p2101_p13) target bundleno = 92 (0x5c), region = 24 }
  0x18   : > { %191 = sbr.rel (!%p80_p5) target bundleno = 92 (0x5c), region = 28  ;;  %s193_s12 = sand.u32 (%p80_p5), 1, %s2714_s22  }
  0x19   : > { %s2102_s13 = sshll.u32 (%p80_p5), %s65_s28, 2  ;;  %s2458_s14 = smul.u32 (%p80_p5), 384, %s193_s12 }
  0x1a   : > { %s2826_s17 = scalar_lea.vmem (%p80_p5), %s3493_s2, %s2102_s13 }
  0x1b   : > { %v216_v0 = vld [vmem:[%s2826_s17] sm:$0xf] (%p80_p5)  ;;  %v218_v1 = vld [vmem:[%s2826_s17 + $0xc] sm:$0xf] (%p80_p5)  ;;  %v220_v2 = vld [vmem:[%s2826_s17 + $0x18] sm:$0xf] (%p80_p5) }
  0x1c   : > { %v222_v3 = vld [vmem:[%s2826_s17 + $0x24] sm:$0xf] (%p80_p5)  ;;  %v224_v4 = vld [vmem:[%s2826_s17 + $0x30] sm:$0xf] (%p80_p5)  ;;  %s2833_s25 = scalar_lea.vmem (%p80_p5), [#allocation2], %s2458_s14 }
  0x1d   : > { %217 = vst [vmem:[%s2833_s25] sm:$0xf] %v216_v0  ;;  %219 = vst [vmem:[%s2833_s25 + $0x4] sm:$0xf] %v218_v1  ;;  %v226_v5 = vld [vmem:[%s2826_s17 + $0x3c] sm:$0xf] }
  0x1e   : > { %221 = vst [vmem:[%s2833_s25 + $0x8] sm:$0xf] %v220_v2  ;;  %223 = vst [vmem:[%s2833_s25 + $0xc] sm:$0xf] %v222_v3  ;;  %v228_v6 = vld [vmem:[%s2826_s17 + $0x48] sm:$0xf] }
  0x1f   : > { %225 = vst [vmem:[%s2833_s25 + $0x10] sm:$0xf] %v224_v4  ;;  %v230_v7 = vld [vmem:[%s2826_s17 + $0x54] sm:$0xf]  ;;  %227 = vst [vmem:[%s2833_s25 + $0x14] sm:$0xf] %v226_v5 }
  0x20   : > { %229 = vst [vmem:[%s2833_s25 + $0x18] sm:$0xf] %v228_v6  ;;  %231 = vst [vmem:[%s2833_s25 + $0x1c] sm:$0xf] %v230_v7  ;;  %v232_v8 = vld [vmem:[%s2826_s17 + $0x60] sm:$0xf] }
  0x21   : > { %v234_v9 = vld [vmem:[%s2826_s17 + $0x6c] sm:$0xf]  ;;  %v236_v10 = vld [vmem:[%s2826_s17 + $0x78] sm:$0xf]  ;;  %233 = vst [vmem:[%s2833_s25 + $0x20] sm:$0xf] %v232_v8 }
  0x22   : > { %235 = vst [vmem:[%s2833_s25 + $0x24] sm:$0xf] %v234_v9  ;;  %237 = vst [vmem:[%s2833_s25 + $0x28] sm:$0xf] %v236_v10  ;;  %v238_v11 = vld [vmem:[%s2826_s17 + $0x84] sm:$0xf] }
  0x23   : > { %v240_v12 = vld [vmem:[%s2826_s17 + $0x90] sm:$0xf]  ;;  %v242_v13 = vld [vmem:[%s2826_s17 + $0x9c] sm:$0xf]  ;;  %239 = vst [vmem:[%s2833_s25 + $0x2c] sm:$0xf] %v238_v11 }
  0x24   : > { %241 = vst [vmem:[%s2833_s25 + $0x30] sm:$0xf] %v240_v12  ;;  %243 = vst [vmem:[%s2833_s25 + $0x34] sm:$0xf] %v242_v13  ;;  %v244_v14 = vld [vmem:[%s2826_s17 + $0xa8] sm:$0xf] }
  0x25   : > { %v246_v15 = vld [vmem:[%s2826_s17 + $0xb4] sm:$0xf]  ;;  %v248_v16 = vld [vmem:[%s2826_s17 + $0xc0] sm:$0xf]  ;;  %245 = vst [vmem:[%s2833_s25 + $0x38] sm:$0xf] %v244_v14 }
  0x26   : > { %247 = vst [vmem:[%s2833_s25 + $0x3c] sm:$0xf] %v246_v15  ;;  %249 = vst [vmem:[%s2833_s25 + $0x40] sm:$0xf] %v248_v16  ;;  %v250_v17 = vld [vmem:[%s2826_s17 + $0xcc] sm:$0xf] }
  0x27   : > { %v252_v18 = vld [vmem:[%s2826_s17 + $0xd8] sm:$0xf]  ;;  %v254_v19 = vld [vmem:[%s2826_s17 + $0xe4] sm:$0xf]  ;;  %251 = vst [vmem:[%s2833_s25 + $0x44] sm:$0xf] %v250_v17 }
  0x28   : > { %253 = vst [vmem:[%s2833_s25 + $0x48] sm:$0xf] %v252_v18  ;;  %255 = vst [vmem:[%s2833_s25 + $0x4c] sm:$0xf] %v254_v19  ;;  %v256_v20 = vld [vmem:[%s2826_s17 + $0xf0] sm:$0xf] }
  0x29   : > { %v258_v21 = vld [vmem:[%s2826_s17 + $0xfc] sm:$0xf]  ;;  %v260_v22 = vld [vmem:[%s2826_s17 + $0x108] sm:$0xf]  ;;  %257 = vst [vmem:[%s2833_s25 + $0x50] sm:$0xf] %v256_v20 }
  0x2a   : > { %259 = vst [vmem:[%s2833_s25 + $0x54] sm:$0xf] %v258_v21  ;;  %261 = vst [vmem:[%s2833_s25 + $0x58] sm:$0xf] %v260_v22  ;;  %v262_v23 = vld [vmem:[%s2826_s17 + $0x114] sm:$0xf] }
  0x2b   : > { %v264_v24 = vld [vmem:[%s2826_s17 + $0x120] sm:$0xf]  ;;  %v266_v25 = vld [vmem:[%s2826_s17 + $0x12c] sm:$0xf]  ;;  %263 = vst [vmem:[%s2833_s25 + $0x5c] sm:$0xf] %v262_v23 }
  0x2c   : > { %265 = vst [vmem:[%s2833_s25 + $0x60] sm:$0xf] %v264_v24  ;;  %267 = vst [vmem:[%s2833_s25 + $0x64] sm:$0xf] %v266_v25  ;;  %v268_v26 = vld [vmem:[%s2826_s17 + $0x138] sm:$0xf] }
  0x2d   : > { %v270_v27 = vld [vmem:[%s2826_s17 + $0x144] sm:$0xf]  ;;  %v272_v28 = vld [vmem:[%s2826_s17 + $0x150] sm:$0xf]  ;;  %269 = vst [vmem:[%s2833_s25 + $0x68] sm:$0xf] %v268_v26 }
  0x2e   : > { %271 = vst [vmem:[%s2833_s25 + $0x6c] sm:$0xf] %v270_v27  ;;  %273 = vst [vmem:[%s2833_s25 + $0x70] sm:$0xf] %v272_v28  ;;  %v274_v29 = vld [vmem:[%s2826_s17 + $0x15c] sm:$0xf] }
  0x2f   : > { %v276_v30 = vld [vmem:[%s2826_s17 + $0x168] sm:$0xf]  ;;  %v278_v31 = vld [vmem:[%s2826_s17 + $0x174] sm:$0xf]  ;;  %275 = vst [vmem:[%s2833_s25 + $0x74] sm:$0xf] %v274_v29 }
  0x30   : > { %277 = vst [vmem:[%s2833_s25 + $0x78] sm:$0xf] %v276_v30  ;;  %279 = vst [vmem:[%s2833_s25 + $0x7c] sm:$0xf] %v278_v31  ;;  %v280_v32 = vld [vmem:[%s2826_s17 + $0x180] sm:$0xf] }
  0x31   : > { %v282_v33 = vld [vmem:[%s2826_s17 + $0x18c] sm:$0xf]  ;;  %v284_v34 = vld [vmem:[%s2826_s17 + $0x198] sm:$0xf]  ;;  %281 = vst [vmem:[%s2833_s25 + $0x80] sm:$0xf] %v280_v32 }
  0x32   : > { %283 = vst [vmem:[%s2833_s25 + $0x84] sm:$0xf] %v282_v33  ;;  %285 = vst [vmem:[%s2833_s25 + $0x88] sm:$0xf] %v284_v34  ;;  %v286_v35 = vld [vmem:[%s2826_s17 + $0x1a4] sm:$0xf] }
  0x33   : > { %v288_v36 = vld [vmem:[%s2826_s17 + $0x1b0] sm:$0xf]  ;;  %v290_v37 = vld [vmem:[%s2826_s17 + $0x1bc] sm:$0xf]  ;;  %287 = vst [vmem:[%s2833_s25 + $0x8c] sm:$0xf] %v286_v35 }
  0x34   : > { %289 = vst [vmem:[%s2833_s25 + $0x90] sm:$0xf] %v288_v36  ;;  %291 = vst [vmem:[%s2833_s25 + $0x94] sm:$0xf] %v290_v37  ;;  %v292_v38 = vld [vmem:[%s2826_s17 + $0x1c8] sm:$0xf] }
  0x35   : > { %v294_v39 = vld [vmem:[%s2826_s17 + $0x1d4] sm:$0xf]  ;;  %v296_v40 = vld [vmem:[%s2826_s17 + $0x1e0] sm:$0xf]  ;;  %293 = vst [vmem:[%s2833_s25 + $0x98] sm:$0xf] %v292_v38 }
  0x36   : > { %295 = vst [vmem:[%s2833_s25 + $0x9c] sm:$0xf] %v294_v39  ;;  %297 = vst [vmem:[%s2833_s25 + $0xa0] sm:$0xf] %v296_v40  ;;  %v298_v41 = vld [vmem:[%s2826_s17 + $0x1ec] sm:$0xf] }
  0x37   : > { %v300_v42 = vld [vmem:[%s2826_s17 + $0x1f8] sm:$0xf]  ;;  %v302_v43 = vld [vmem:[%s2826_s17 + $0x204] sm:$0xf]  ;;  %299 = vst [vmem:[%s2833_s25 + $0xa4] sm:$0xf] %v298_v41 }
  0x38   : > { %301 = vst [vmem:[%s2833_s25 + $0xa8] sm:$0xf] %v300_v42  ;;  %303 = vst [vmem:[%s2833_s25 + $0xac] sm:$0xf] %v302_v43  ;;  %v304_v44 = vld [vmem:[%s2826_s17 + $0x210] sm:$0xf] }
  0x39   : > { %v306_v45 = vld [vmem:[%s2826_s17 + $0x21c] sm:$0xf]  ;;  %v308_v46 = vld [vmem:[%s2826_s17 + $0x228] sm:$0xf]  ;;  %305 = vst [vmem:[%s2833_s25 + $0xb0] sm:$0xf] %v304_v44 }
  0x3a   : > { %307 = vst [vmem:[%s2833_s25 + $0xb4] sm:$0xf] %v306_v45  ;;  %309 = vst [vmem:[%s2833_s25 + $0xb8] sm:$0xf] %v308_v46  ;;  %v310_v47 = vld [vmem:[%s2826_s17 + $0x234] sm:$0xf] }
  0x3b   : > { %v312_v48 = vld [vmem:[%s2826_s17 + $0x240] sm:$0xf]  ;;  %v314_v49 = vld [vmem:[%s2826_s17 + $0x24c] sm:$0xf]  ;;  %311 = vst [vmem:[%s2833_s25 + $0xbc] sm:$0xf] %v310_v47 }
  0x3c   : > { %313 = vst [vmem:[%s2833_s25 + $0xc0] sm:$0xf] %v312_v48  ;;  %315 = vst [vmem:[%s2833_s25 + $0xc4] sm:$0xf] %v314_v49  ;;  %v316_v50 = vld [vmem:[%s2826_s17 + $0x258] sm:$0xf] }
  0x3d   : > { %v318_v51 = vld [vmem:[%s2826_s17 + $0x264] sm:$0xf]  ;;  %v320_v52 = vld [vmem:[%s2826_s17 + $0x270] sm:$0xf]  ;;  %317 = vst [vmem:[%s2833_s25 + $0xc8] sm:$0xf] %v316_v50 }
  0x3e   : > { %319 = vst [vmem:[%s2833_s25 + $0xcc] sm:$0xf] %v318_v51  ;;  %321 = vst [vmem:[%s2833_s25 + $0xd0] sm:$0xf] %v320_v52  ;;  %v322_v53 = vld [vmem:[%s2826_s17 + $0x27c] sm:$0xf] }
  0x3f   : > { %v324_v54 = vld [vmem:[%s2826_s17 + $0x288] sm:$0xf]  ;;  %v326_v55 = vld [vmem:[%s2826_s17 + $0x294] sm:$0xf]  ;;  %323 = vst [vmem:[%s2833_s25 + $0xd4] sm:$0xf] %v322_v53 }
  0x40   : > { %325 = vst [vmem:[%s2833_s25 + $0xd8] sm:$0xf] %v324_v54  ;;  %327 = vst [vmem:[%s2833_s25 + $0xdc] sm:$0xf] %v326_v55  ;;  %v328_v56 = vld [vmem:[%s2826_s17 + $0x2a0] sm:$0xf] }
  0x41   : > { %v330_v57 = vld [vmem:[%s2826_s17 + $0x2ac] sm:$0xf]  ;;  %v332_v58 = vld [vmem:[%s2826_s17 + $0x2b8] sm:$0xf]  ;;  %329 = vst [vmem:[%s2833_s25 + $0xe0] sm:$0xf] %v328_v56 }
  0x42   : > { %331 = vst [vmem:[%s2833_s25 + $0xe4] sm:$0xf] %v330_v57  ;;  %333 = vst [vmem:[%s2833_s25 + $0xe8] sm:$0xf] %v332_v58  ;;  %v334_v59 = vld [vmem:[%s2826_s17 + $0x2c4] sm:$0xf] }
  0x43   : > { %v336_v60 = vld [vmem:[%s2826_s17 + $0x2d0] sm:$0xf]  ;;  %v338_v61 = vld [vmem:[%s2826_s17 + $0x2dc] sm:$0xf]  ;;  %335 = vst [vmem:[%s2833_s25 + $0xec] sm:$0xf] %v334_v59 }
  0x44   : > { %337 = vst [vmem:[%s2833_s25 + $0xf0] sm:$0xf] %v336_v60  ;;  %339 = vst [vmem:[%s2833_s25 + $0xf4] sm:$0xf] %v338_v61  ;;  %v340_v62 = vld [vmem:[%s2826_s17 + $0x2e8] sm:$0xf] }
  0x45   : > { %v342_v63 = vld [vmem:[%s2826_s17 + $0x2f4] sm:$0xf]  ;;  %v344_v0 = vld [vmem:[%s2826_s17 + $0x300] sm:$0xf]  ;;  %341 = vst [vmem:[%s2833_s25 + $0xf8] sm:$0xf] %v340_v62 }
  0x46   : > { %343 = vst [vmem:[%s2833_s25 + $0xfc] sm:$0xf] %v342_v63  ;;  %345 = vst [vmem:[%s2833_s25 + $0x100] sm:$0xf] %v344_v0  ;;  %v346_v1 = vld [vmem:[%s2826_s17 + $0x30c] sm:$0xf] }
  0x47   : > { %v348_v2 = vld [vmem:[%s2826_s17 + $0x318] sm:$0xf]  ;;  %v350_v3 = vld [vmem:[%s2826_s17 + $0x324] sm:$0xf]  ;;  %347 = vst [vmem:[%s2833_s25 + $0x104] sm:$0xf] %v346_v1 }
  0x48   : > { %349 = vst [vmem:[%s2833_s25 + $0x108] sm:$0xf] %v348_v2  ;;  %351 = vst [vmem:[%s2833_s25 + $0x10c] sm:$0xf] %v350_v3  ;;  %v352_v4 = vld [vmem:[%s2826_s17 + $0x330] sm:$0xf] }
  0x49   : > { %v354_v5 = vld [vmem:[%s2826_s17 + $0x33c] sm:$0xf]  ;;  %v356_v6 = vld [vmem:[%s2826_s17 + $0x348] sm:$0xf]  ;;  %353 = vst [vmem:[%s2833_s25 + $0x110] sm:$0xf] %v352_v4 }
  0x4a   : > { %355 = vst [vmem:[%s2833_s25 + $0x114] sm:$0xf] %v354_v5  ;;  %357 = vst [vmem:[%s2833_s25 + $0x118] sm:$0xf] %v356_v6  ;;  %v358_v7 = vld [vmem:[%s2826_s17 + $0x354] sm:$0xf] }
  0x4b   : > { %v360_v8 = vld [vmem:[%s2826_s17 + $0x360] sm:$0xf]  ;;  %v362_v9 = vld [vmem:[%s2826_s17 + $0x36c] sm:$0xf]  ;;  %359 = vst [vmem:[%s2833_s25 + $0x11c] sm:$0xf] %v358_v7 }
  0x4c   : > { %361 = vst [vmem:[%s2833_s25 + $0x120] sm:$0xf] %v360_v8  ;;  %363 = vst [vmem:[%s2833_s25 + $0x124] sm:$0xf] %v362_v9  ;;  %v364_v10 = vld [vmem:[%s2826_s17 + $0x378] sm:$0xf] }
  0x4d   : > { %v366_v11 = vld [vmem:[%s2826_s17 + $0x384] sm:$0xf]  ;;  %v368_v12 = vld [vmem:[%s2826_s17 + $0x390] sm:$0xf]  ;;  %365 = vst [vmem:[%s2833_s25 + $0x128] sm:$0xf] %v364_v10 }
  0x4e   : > { %367 = vst [vmem:[%s2833_s25 + $0x12c] sm:$0xf] %v366_v11  ;;  %369 = vst [vmem:[%s2833_s25 + $0x130] sm:$0xf] %v368_v12  ;;  %v370_v13 = vld [vmem:[%s2826_s17 + $0x39c] sm:$0xf] }
  0x4f   : > { %v372_v14 = vld [vmem:[%s2826_s17 + $0x3a8] sm:$0xf]  ;;  %v374_v15 = vld [vmem:[%s2826_s17 + $0x3b4] sm:$0xf]  ;;  %371 = vst [vmem:[%s2833_s25 + $0x134] sm:$0xf] %v370_v13 }
  0x50   : > { %373 = vst [vmem:[%s2833_s25 + $0x138] sm:$0xf] %v372_v14  ;;  %375 = vst [vmem:[%s2833_s25 + $0x13c] sm:$0xf] %v374_v15  ;;  %v376_v16 = vld [vmem:[%s2826_s17 + $0x3c0] sm:$0xf] }
  0x51   : > { %v378_v17 = vld [vmem:[%s2826_s17 + $0x3cc] sm:$0xf]  ;;  %v380_v18 = vld [vmem:[%s2826_s17 + $0x3d8] sm:$0xf]  ;;  %377 = vst [vmem:[%s2833_s25 + $0x140] sm:$0xf] %v376_v16 }
  0x52   : > { %379 = vst [vmem:[%s2833_s25 + $0x144] sm:$0xf] %v378_v17  ;;  %381 = vst [vmem:[%s2833_s25 + $0x148] sm:$0xf] %v380_v18  ;;  %v382_v19 = vld [vmem:[%s2826_s17 + $0x3e4] sm:$0xf] }
  0x53   : > { %v384_v20 = vld [vmem:[%s2826_s17 + $0x3f0] sm:$0xf]  ;;  %v386_v21 = vld [vmem:[%s2826_s17 + $0x3fc] sm:$0xf]  ;;  %383 = vst [vmem:[%s2833_s25 + $0x14c] sm:$0xf] %v382_v19 }
  0x54   : > { %385 = vst [vmem:[%s2833_s25 + $0x150] sm:$0xf] %v384_v20  ;;  %387 = vst [vmem:[%s2833_s25 + $0x154] sm:$0xf] %v386_v21  ;;  %v388_v22 = vld [vmem:[%s2826_s17 + $0x408] sm:$0xf] }
  0x55   : > { %v390_v23 = vld [vmem:[%s2826_s17 + $0x414] sm:$0xf]  ;;  %v392_v24 = vld [vmem:[%s2826_s17 + $0x420] sm:$0xf]  ;;  %389 = vst [vmem:[%s2833_s25 + $0x158] sm:$0xf] %v388_v22 }
  0x56   : > { %391 = vst [vmem:[%s2833_s25 + $0x15c] sm:$0xf] %v390_v23  ;;  %393 = vst [vmem:[%s2833_s25 + $0x160] sm:$0xf] %v392_v24  ;;  %v394_v25 = vld [vmem:[%s2826_s17 + $0x42c] sm:$0xf] }
  0x57   : > { %v396_v26 = vld [vmem:[%s2826_s17 + $0x438] sm:$0xf]  ;;  %v398_v27 = vld [vmem:[%s2826_s17 + $0x444] sm:$0xf]  ;;  %395 = vst [vmem:[%s2833_s25 + $0x164] sm:$0xf] %v394_v25 }
  0x58   : > { %397 = vst [vmem:[%s2833_s25 + $0x168] sm:$0xf] %v396_v26  ;;  %399 = vst [vmem:[%s2833_s25 + $0x16c] sm:$0xf] %v398_v27  ;;  %v400_v28 = vld [vmem:[%s2826_s17 + $0x450] sm:$0xf] }
  0x59   : > { %v402_v29 = vld [vmem:[%s2826_s17 + $0x45c] sm:$0xf]  ;;  %v404_v30 = vld [vmem:[%s2826_s17 + $0x468] sm:$0xf]  ;;  %401 = vst [vmem:[%s2833_s25 + $0x170] sm:$0xf] %v400_v28 }
  0x5a   : > { %403 = vst [vmem:[%s2833_s25 + $0x174] sm:$0xf] %v402_v29  ;;  %405 = vst [vmem:[%s2833_s25 + $0x178] sm:$0xf] %v404_v30  ;;  %v406_v31 = vld [vmem:[%s2826_s17 + $0x474] sm:$0xf] }
  0x5b   : > { %407 = vst [vmem:[%s2833_s25 + $0x17c] sm:$0xf] %v406_v31 }
  0x5c PF: > { %p2103_p0 = scmp.ge.s32.totalorder %s2718_s23, 1  ;;  %p634_p1 = scmp.lt.s32.totalorder %s2718_s23, 5 }
  0x5e   : > { %p635_p2 = pnand %p2103_p0, %p634_p1 }
  0x5f   : > { %s641_s27 = sand.u32 (!%p635_p2), 1, %s2710_s21   ;;  %s671_s28 = sand.u32 (!%p635_p2), 1, %s2702_s19  }
  0x60   : > { %638 = sbr.rel (%p635_p2) target bundleno = 693 (0x2b5), region = 77  ;;  %s2104_s30 = sshll.u32 (!%p635_p2), %s671_s28, 7 }
  0x61   : > { %s2459_s29 = smul.u32 (!%p635_p2), 384, %s641_s27  ;;  %p676_p3 = scmp.lt.s32.totalorder (!%p635_p2), %s2785_s24, 3 }
  0x62   : > { %s3042_s25 = scalar_lea.vmem (!%p635_p2), [#allocation3], %s2104_s30  ;;  %p2105_p4 = scmp.ge.s32.totalorder (!%p635_p2), %s2785_s24, 3 }
  0x63   : > { %s3040_s17 = scalar_lea.vmem (!%p635_p2), [#allocation2], %s2459_s29 }
  0x65   : > { %s677_s6 = scalar_select %p676_p3, %s2785_s24, 3 }
  0x66   : > { %686 = sbr.rel (%p2105_p4) target bundleno = 533 (0x215), region = 85 }
  0x67   : > { %s3033_s13 = scalar_lea.vmem %s3494_s3, %s677_s6  ;;  %s3038_s16 = scalar_lea.vmem %s3495_s4, %s677_s6 }
  0x6b   : > { %v2518_v32 = vld [vmem:[%s3040_s17 + $0x78] sm:$0xff]   ;;  %v2520_v34 = vld [vmem:[%s3040_s17 + $0x70] sm:$0xff]   ;;  %v2522_v36 = vld [vmem:[%s3040_s17 + $0x68] sm:$0xff]  }
  0x6c   : > { %v2519_v33 = vld [vmem:[%s3040_s17 + $0x38] sm:$0xff]   ;;  %2250 = vmatprep.subr.bf16.mxu0 %v2518_v32  ;;  %2442 = vmatprep.subr.bf16.mxu1 %v2518_v32  ;;  %v2521_v35 = vld [vmem:[%s3040_s17 + $0x30] sm:$0xff]   ;;  %v2523_v37 = vld [vmem:[%s3040_s17 + $0x28] sm:$0xff]  }
  0x6d   : > { %2251 = vmatpush3.bf16.msra.mxu0 %v2519_v33  ;;  %2450 = vmatpush3.bf16.msra.mxu1 %v2519_v33  ;;  %v2524_v38 = vld [vmem:[%s3040_s17 + $0x60] sm:$0xff]   ;;  %v2526_v40 = vld [vmem:[%s3040_s17 + $0x58] sm:$0xff]   ;;  %v2528_v42 = vld [vmem:[%s3040_s17 + $0x50] sm:$0xff]  }
  0x6e   : > { %2252 = vmatprep.subr.bf16.mxu0 %v2520_v34  ;;  %2443 = vmatprep.subr.bf16.mxu1 %v2520_v34  ;;  %v2525_v39 = vld [vmem:[%s3040_s17 + $0x20] sm:$0xff]   ;;  %v2527_v41 = vld [vmem:[%s3040_s17 + $0x18] sm:$0xff]   ;;  %v2529_v45 = vld [vmem:[%s3040_s17 + $0x10] sm:$0xff]  }
  0x6f   : > { %v2536_v43 = vld [vmem:[%s3491_s0 + $0x4] ss:$24 sps:$4 sm:$0xff]   ;;  %v2530_v46 = vld [vmem:[%s3040_s17 + $0x48] sm:$0xff]   ;;  %v2534_v50 = vld [vmem:[%s3491_s0] ss:$24 sps:$4 sm:$0xff]  }
  0x70   : > { %v2539_v44 = vld [vmem:[%s3491_s0 + $0xc4] ss:$24 sps:$4 sm:$0xff]   ;;  %1391 = vmatprep.mubr.bf16.mxu0 %v2536_v43  ;;  %v2531_v47 = vld [vmem:[%s3040_s17 + $0x8] sm:$0xff]   ;;  %v2537_v51 = vld [vmem:[%s3491_s0 + $0xc0] ss:$24 sps:$4 sm:$0xff]  }
  0x71   : > { %2253 = vmatpush3.bf16.msra.mxu0 %v2521_v35  ;;  %2451 = vmatpush3.bf16.msra.mxu1 %v2521_v35  ;;  %v2532_v48 = vld [vmem:[%s3040_s17 + $0x40] sm:$0xff]   ;;  %v2540_v52 = vld [vmem:[%s3040_s17 + $0xf8] sm:$0xff]   ;;  %v2544_v56 = vld [vmem:[%s3040_s17 + $0xf0] sm:$0xff]  }
  0x72   : > { %2254 = vmatprep.subr.bf16.mxu0 %v2522_v36  ;;  %2444 = vmatprep.subr.bf16.mxu1 %v2522_v36  ;;  %v2533_v49 = vld [vmem:[%s3040_s17] sm:$0xff]   ;;  %v2541_v53 = vld [vmem:[%s3040_s17 + $0x178] sm:$0xff]   ;;  %v2545_v57 = vld [vmem:[%s3040_s17 + $0x170] sm:$0xff]  }
  0x73   : > { %1423 = vmatprep.mubr.bf16.mxu1 %v2539_v44  ;;  %v2542_v54 = vld [vmem:[%s3040_s17 + $0xb8] sm:$0xff]   ;;  %v2548_v58 = vld [vmem:[%s3491_s0 + $0x34] ss:$24 sps:$4 sm:$0xff]   ;;  %v2552_v63 = vld [vmem:[%s3491_s0 + $0x30] ss:$24 sps:$4 sm:$0xff]  }
  0x74   : > { %v2543_v55 = vld [vmem:[%s3040_s17 + $0x138] sm:$0xff]   ;;  %v2546_v59 = vld [vmem:[%s3040_s17 + $0xb0] sm:$0xff]   ;;  %v2554_v62 = vld [vmem:[%s3040_s17 + $0xe8] sm:$0xff]  }
  0x75   : > { %2255 = vmatpush3.bf16.msra.mxu0 %v2523_v37  ;;  %2452 = vmatpush3.bf16.msra.mxu1 %v2523_v37  ;;  %v2550_v60 = vld [vmem:[%s3491_s0 + $0xf4] ss:$24 sps:$4 sm:$0xff]   ;;  %v2553_v1 = vld [vmem:[%s3491_s0 + $0xf0] ss:$24 sps:$4 sm:$0xff]   ;;  %v2558_v4 = vld [vmem:[%s3040_s17 + $0xe0] sm:$0xff]  }
  0x76   : > { %2256 = vmatprep.subr.bf16.mxu0 %v2524_v38  ;;  %2445 = vmatprep.subr.bf16.mxu1 %v2524_v38  ;;  %v2547_v61 = vld [vmem:[%s3040_s17 + $0x130] sm:$0xff]   ;;  %v2555_v0 = vld [vmem:[%s3040_s17 + $0x168] sm:$0xff]   ;;  %v2559_v5 = vld [vmem:[%s3040_s17 + $0x160] sm:$0xff]  }
  0x77   : > { %v2556_v2 = vld [vmem:[%s3040_s17 + $0xa8] sm:$0xff]   ;;  %v2562_v6 = vld [vmem:[%s3491_s0 + $0x64] ss:$24 sps:$4 sm:$0xff]   ;;  %v2566_v11 = vld [vmem:[%s3491_s0 + $0x60] ss:$24 sps:$4 sm:$0xff]  }
  0x78   : > { %v2557_v3 = vld [vmem:[%s3040_s17 + $0x128] sm:$0xff]   ;;  %v2560_v7 = vld [vmem:[%s3040_s17 + $0xa0] sm:$0xff]   ;;  %v2568_v10 = vld [vmem:[%s3040_s17 + $0xd8] sm:$0xff]  }
  0x79   : > { %2257 = vmatpush3.bf16.msra.mxu0 %v2525_v39  ;;  %2453 = vmatpush3.bf16.msra.mxu1 %v2525_v39  ;;  %v2564_v8 = vld [vmem:[%s3491_s0 + $0x124] ss:$24 sps:$4 sm:$0xff]   ;;  %v2567_v12 = vld [vmem:[%s3491_s0 + $0x120] ss:$24 sps:$4 sm:$0xff]   ;;  %v2572_v16 = vld [vmem:[%s3040_s17 + $0xd0] sm:$0xff]  }
  0x7a   : > { %2258 = vmatprep.subr.bf16.mxu0 %v2526_v40  ;;  %2446 = vmatprep.subr.bf16.mxu1 %v2526_v40  ;;  %v2561_v9 = vld [vmem:[%s3040_s17 + $0x120] sm:$0xff]   ;;  %v2569_v13 = vld [vmem:[%s3040_s17 + $0x158] sm:$0xff]   ;;  %v2573_v17 = vld [vmem:[%s3040_s17 + $0x150] sm:$0xff]  }
  0x7b   : > { %v2570_v14 = vld [vmem:[%s3040_s17 + $0x98] sm:$0xff]   ;;  %v2576_v18 = vld [vmem:[%s3491_s0 + $0x94] ss:$24 sps:$4 sm:$0xff]   ;;  %v2580_v23 = vld [vmem:[%s3491_s0 + $0x90] ss:$24 sps:$4 sm:$0xff]  }
  0x7c   : > { %v2571_v15 = vld [vmem:[%s3040_s17 + $0x118] sm:$0xff]   ;;  %v2578_v19 = vld [vmem:[%s3491_s0 + $0x154] ss:$24 sps:$4 sm:$0xff]   ;;  %v2581_v24 = vld [vmem:[%s3491_s0 + $0x150] ss:$24 sps:$4 sm:$0xff]  }
  0x7d   : > { %2259 = vmatpush3.bf16.msra.mxu0 %v2527_v41  ;;  %2454 = vmatpush3.bf16.msra.mxu1 %v2527_v41  ;;  %v2574_v20 = vld [vmem:[%s3040_s17 + $0x90] sm:$0xff]   ;;  %v2582_v22 = vld [vmem:[%s3040_s17 + $0xc8] sm:$0xff]   ;;  %v2586_v28 = vld [vmem:[%s3040_s17 + $0xc0] sm:$0xff]  }
  0x7e   : > { %2260 = vmatprep.subr.bf16.mxu0 %v2528_v42  ;;  %2447 = vmatprep.subr.bf16.mxu1 %v2528_v42  ;;  %v2575_v21 = vld [vmem:[%s3040_s17 + $0x110] sm:$0xff]   ;;  %v2583_v25 = vld [vmem:[%s3040_s17 + $0x148] sm:$0xff]   ;;  %v2587_v29 = vld [vmem:[%s3040_s17 + $0x140] sm:$0xff]  }
  0x7f   : > { %v2584_v26 = vld [vmem:[%s3040_s17 + $0x88] sm:$0xff]   ;;  %v2588_v30 = vld [vmem:[%s3040_s17 + $0x80] sm:$0xff]   ;;  %v2596_v36 = vld [vmem:[%s3491_s0 + $0x3c] ss:$24 sps:$4 sm:$0xff]  }
  0x80   : > { %v2585_v27 = vld [vmem:[%s3040_s17 + $0x108] sm:$0xff]   ;;  %v2589_v31 = vld [vmem:[%s3040_s17 + $0x100] sm:$0xff]   ;;  %v2600_v38 = vld [vmem:[%s3491_s0 + $0x38] ss:$24 sps:$4 sm:$0xff]  }
  0x81   : > { %2261 = vmatpush3.bf16.msra.mxu0 %v2529_v45  ;;  %2455 = vmatpush3.bf16.msra.mxu1 %v2529_v45  ;;  %v2592_v32 = vld [vmem:[%s3491_s0 + $0xc] ss:$24 sps:$4 sm:$0xff]   ;;  %v2590_v33 = vld [vmem:[%s3491_s0 + $0x8] ss:$24 sps:$4 sm:$0xff]   ;;  %v2608_v44 = vld [vmem:[%s3491_s0 + $0x9c] ss:$24 sps:$4 sm:$0xff]  }
  0x82   : > { %2262 = vmatprep.subr.bf16.mxu0 %v2530_v46  ;;  %2448 = vmatprep.subr.bf16.mxu1 %v2530_v46  ;;  %v2595_v34 = vld [vmem:[%s3491_s0 + $0x14] ss:$24 sps:$4 sm:$0xff]   ;;  %v2593_v35 = vld [vmem:[%s3491_s0 + $0x10] ss:$24 sps:$4 sm:$0xff]   ;;  %v2598_v37 = vld [vmem:[%s3491_s0 + $0x44] ss:$24 sps:$4 sm:$0xff]  }
  0x83   : > { %v2601_v39 = vld [vmem:[%s3491_s0 + $0x40] ss:$24 sps:$4 sm:$0xff]   ;;  %v2602_v40 = vld [vmem:[%s3491_s0 + $0x6c] ss:$24 sps:$4 sm:$0xff]   ;;  %v2607_v43 = vld [vmem:[%s3491_s0 + $0x70] ss:$24 sps:$4 sm:$0xff]  }
  0x84   : > { %v2604_v41 = vld [vmem:[%s3491_s0 + $0x74] ss:$24 sps:$4 sm:$0xff]   ;;  %v2606_v42 = vld [vmem:[%s3491_s0 + $0x68] ss:$24 sps:$4 sm:$0xff]   ;;  %v2610_v45 = vld [vmem:[%s3491_s0 + $0xa4] ss:$24 sps:$4 sm:$0xff]  }
  0x85   : > { %2263 = vmatpush3.bf16.msra.mxu0 %v2531_v47  ;;  %2456 = vmatpush3.bf16.msra.mxu1 %v2531_v47  ;;  %v2612_v46 = vld [vmem:[%s3491_s0 + $0x98] ss:$24 sps:$4 sm:$0xff]  }
  0x86   : > { %2264 = vmatprep.subr.bf16.mxu0 %v2532_v48  ;;  %2449 = vmatprep.subr.bf16.mxu1 %v2532_v48  ;;  %v2613_v47 = vld [vmem:[%s3491_s0 + $0xa0] ss:$24 sps:$4 sm:$0xff]   ;;  %v2614_v48 = vld [vmem:[%s3491_s0 + $0xcc] ss:$24 sps:$4 sm:$0xff]  }
  0x89   : > { %2265 = vmatpush3.bf16.msra.mxu0 %v2533_v49  ;;  %2457 = vmatpush3.bf16.msra.mxu1 %v2533_v49  ;;  %v2616_v49 = vld [vmem:[%s3491_s0 + $0xd4] ss:$24 sps:$4 sm:$0xff]  }
  0x8a   : > { %2314 = vmatprep.subr.bf16.mxu1 %v2540_v52  ;;  %2378 = vmatprep.subr.bf16.mxu0 %v2541_v53  ;;  %v2620_v52 = vld [vmem:[%s3491_s0 + $0xfc] ss:$24 sps:$4 sm:$0xff]  }
  0x8b   : > { %v2622_v53 = vld [vmem:[%s3491_s0 + $0x104] ss:$24 sps:$4 sm:$0xff]  }
  0x8c   : > { %1392 = vmatmul.mubr.bf16.vlgmr.msra.gmra.mxu0 %v2534_v50  ;;  %1424 = vmatmul.mubr.bf16.vlgmr.msra.gmra.mxu1 %v2537_v51  ;;  %v2618_v50 = vld [vmem:[%s3491_s0 + $0xc8] ss:$24 sps:$4 sm:$0xff]  }
  0x8d   : > { %2315 = vmatpush3.bf16.msra.mxu1 %v2542_v54  ;;  %2379 = vmatpush3.bf16.msra.mxu0 %v2543_v55  ;;  %v2619_v51 = vld [vmem:[%s3491_s0 + $0xd0] ss:$24 sps:$4 sm:$0xff]   ;;  %v2625_v55 = vld [vmem:[%s3491_s0 + $0x100] ss:$24 sps:$4 sm:$0xff]  }
  0x8e   : > { %2316 = vmatprep.subr.bf16.mxu1 %v2544_v56  ;;  %2380 = vmatprep.subr.bf16.mxu0 %v2545_v57  ;;  %v2624_v54 = vld [vmem:[%s3491_s0 + $0xf8] ss:$24 sps:$4 sm:$0xff]   ;;  %v2626_v56 = vld [vmem:[%s3491_s0 + $0x12c] ss:$24 sps:$4 sm:$0xff]  }
  0x8f   : > { %1399 = vmatprep.mubr.bf16.mxu0 %v2548_v58  ;;  %1431 = vmatprep.mubr.bf16.mxu1 %v2550_v60  ;;  %v2628_v57 = vld [vmem:[%s3491_s0 + $0x134] ss:$24 sps:$4 sm:$0xff]   ;;  %v2630_v58 = vld [vmem:[%s3491_s0 + $0x128] ss:$24 sps:$4 sm:$0xff]  }
  0x90   : > { %v2632_v60 = vld [vmem:[%s3491_s0 + $0x15c] ss:$24 sps:$4 sm:$0xff]  }
  0x91   : > { %2317 = vmatpush3.bf16.msra.mxu1 %v2546_v59  ;;  %2381 = vmatpush3.bf16.msra.mxu0 %v2547_v61  ;;  %v2631_v59 = vld [vmem:[%s3491_s0 + $0x130] ss:$24 sps:$4 sm:$0xff]   ;;  %v2634_v61 = vld [vmem:[%s3491_s0 + $0x164] ss:$24 sps:$4 sm:$0xff]  }
  0x92   : > { %2318 = vmatprep.subr.bf16.mxu1 %v2554_v62  ;;  %2382 = vmatprep.subr.bf16.mxu0 %v2555_v0  ;;  %v2636_v62 = vld [vmem:[%s3491_s0 + $0x158] ss:$24 sps:$4 sm:$0xff]  }
  0x94   : > { %1400 = vmatmul.mubr.bf16.gmra.mxu0 %v2552_v63  ;;  %1432 = vmatmul.mubr.bf16.gmra.mxu1 %v2553_v1  ;;  %v2637_v63 = vld [vmem:[%s3491_s0 + $0x160] ss:$24 sps:$4 sm:$0xff]  }
  0x95   : > { %2319 = vmatpush3.bf16.msra.mxu1 %v2556_v2  ;;  %2383 = vmatpush3.bf16.msra.mxu0 %v2557_v3 }
  0x96   : > { %2320 = vmatprep.subr.bf16.mxu1 %v2558_v4  ;;  %2384 = vmatprep.subr.bf16.mxu0 %v2559_v5 }
  0x97   : > { %1407 = vmatprep.mubr.bf16.mxu0 %v2562_v6  ;;  %1439 = vmatprep.mubr.bf16.mxu1 %v2564_v8 }
  0x99   : > { %2321 = vmatpush3.bf16.msra.mxu1 %v2560_v7  ;;  %2385 = vmatpush3.bf16.msra.mxu0 %v2561_v9 }
  0x9a   : > { %2322 = vmatprep.subr.bf16.mxu1 %v2568_v10  ;;  %2386 = vmatprep.subr.bf16.mxu0 %v2569_v13 }
  0x9c   : > { %1408 = vmatmul.mubr.bf16.gmra.mxu0 %v2566_v11  ;;  %1440 = vmatmul.mubr.bf16.gmra.mxu1 %v2567_v12 }
  0x9d   : > { %2323 = vmatpush3.bf16.msra.mxu1 %v2570_v14  ;;  %2387 = vmatpush3.bf16.msra.mxu0 %v2571_v15 }
  0x9e   : > { %2324 = vmatprep.subr.bf16.mxu1 %v2572_v16  ;;  %2388 = vmatprep.subr.bf16.mxu0 %v2573_v17 }
  0x9f   : > { %1415 = vmatprep.mubr.bf16.mxu0 %v2576_v18  ;;  %1447 = vmatprep.mubr.bf16.mxu1 %v2578_v19 }
  0xa1   : > { %2325 = vmatpush3.bf16.msra.mxu1 %v2574_v20  ;;  %2389 = vmatpush3.bf16.msra.mxu0 %v2575_v21 }
  0xa2   : > { %2326 = vmatprep.subr.bf16.mxu1 %v2582_v22  ;;  %2390 = vmatprep.subr.bf16.mxu0 %v2583_v25 }
  0xa4   : > { %1416 = vmatmul.mubr.bf16.gmra.mxu0 %v2580_v23  ;;  %1448 = vmatmul.mubr.bf16.gmra.mxu1 %v2581_v24 }
  0xa5   : > { %2327 = vmatpush3.bf16.msra.mxu1 %v2584_v26  ;;  %2391 = vmatpush3.bf16.msra.mxu0 %v2585_v27 }
  0xa6   : > { %2328 = vmatprep.subr.bf16.mxu1 %v2586_v28  ;;  %2392 = vmatprep.subr.bf16.mxu0 %v2587_v29 }
  0xa7   : > { %1488 = vmatprep.mubr.bf16.mxu1 %v2592_v32  ;;  %1585 = vmatprep.mubr.bf16.mxu0 %v2595_v34 }
  0xa9   : > { %2329 = vmatpush3.bf16.msra.mxu1 %v2588_v30  ;;  %2393 = vmatpush3.bf16.msra.mxu0 %v2589_v31 }
  0xac   : > { %1489 = vmatmul.mubr.bf16.vlgmr.msra.gmra.mxu1 %v2590_v33  ;;  %1586 = vmatmul.mubr.bf16.vlgmr.msra.gmra.mxu0 %v2593_v35 }
  0xad   : > { %1496 = vmatprep.mubr.bf16.mxu1 %v2596_v36  ;;  %1593 = vmatprep.mubr.bf16.mxu0 %v2598_v37 }
  0xb4   : > { %1497 = vmatmul.mubr.bf16.gmra.mxu1 %v2600_v38  ;;  %1594 = vmatmul.mubr.bf16.gmra.mxu0 %v2601_v39 }
  0xb5   : > { %1504 = vmatprep.mubr.bf16.mxu1 %v2602_v40  ;;  %1601 = vmatprep.mubr.bf16.mxu0 %v2604_v41 }
  0xbc   : > { %1505 = vmatmul.mubr.bf16.gmra.mxu1 %v2606_v42  ;;  %1602 = vmatmul.mubr.bf16.gmra.mxu0 %v2607_v43 }
  0xbd   : > { %1512 = vmatprep.mubr.bf16.mxu1 %v2608_v44  ;;  %1609 = vmatprep.mubr.bf16.mxu0 %v2610_v45 }
  0xc4   : > { %1513 = vmatmul.mubr.bf16.gmra.mxu1 %v2612_v46  ;;  %1610 = vmatmul.mubr.bf16.gmra.mxu0 %v2613_v47 }
  0xc5   : > { %1520 = vmatprep.mubr.bf16.mxu1 %v2614_v48  ;;  %1617 = vmatprep.mubr.bf16.mxu0 %v2616_v49 }
  0xcc   : > { %1521 = vmatmul.mubr.bf16.gmra.mxu1 %v2618_v50  ;;  %1618 = vmatmul.mubr.bf16.gmra.mxu0 %v2619_v51 }
  0xcd   : > { %1528 = vmatprep.mubr.bf16.mxu1 %v2620_v52  ;;  %1625 = vmatprep.mubr.bf16.mxu0 %v2622_v53 }
  0xd4   : > { %1529 = vmatmul.mubr.bf16.gmra.mxu1 %v2624_v54  ;;  %1626 = vmatmul.mubr.bf16.gmra.mxu0 %v2625_v55 }
  0xd5   : > { %1536 = vmatprep.mubr.bf16.mxu1 %v2626_v56  ;;  %1633 = vmatprep.mubr.bf16.mxu0 %v2628_v57 }
  0xdc   : > { %1537 = vmatmul.mubr.bf16.gmra.mxu1 %v2630_v58  ;;  %1634 = vmatmul.mubr.bf16.gmra.mxu0 %v2631_v59 }
  0xdd   : > { %1544 = vmatprep.mubr.bf16.mxu1 %v2632_v60  ;;  %1641 = vmatprep.mubr.bf16.mxu0 %v2634_v61 }
  0xe4   : > { %1545 = vmatmul.mubr.bf16.gmra.mxu1 %v2636_v62  ;;  %1642 = vmatmul.mubr.bf16.gmra.mxu0 %v2637_v63 }
 0x14c   : > { %v2266_v0 = vpop.f32.mrf.mxu0  ;;  %v2290_v1 = vpop.f32.mrf.mxu1 }
 0x14e   : > { %v2267_v2 = vpop.f32.mrf.mxu0  ;;  %v2291_v3 = vpop.f32.mrf.mxu1 }
 0x14f   : > { %v3237_v4 = vadd.f32 %v2291_v3, %v2290_v1  ;;  %v2268_v62 = vadd.f32 %v2267_v2, %v2266_v0 }
 0x150   : > { %v2269_v5 = vpop.f32.mrf.mxu0  ;;  %v2293_v6 = vpop.f32.mrf.mxu1 }
 0x152   : > { %v2270_v7 = vpop.f32.mrf.mxu0  ;;  %v2294_v8 = vpop.f32.mrf.mxu1 }
 0x153   : > { %v3239_v9 = vadd.f32 %v2294_v8, %v2293_v6  ;;  %v2271_v57 = vadd.f32 %v2270_v7, %v2269_v5 }
 0x154   : > { %v2272_v10 = vpop.f32.mrf.mxu0  ;;  %v2296_v11 = vpop.f32.mrf.mxu1 }
 0x156   : > { %v2273_v12 = vpop.f32.mrf.mxu0  ;;  %v2297_v13 = vpop.f32.mrf.mxu1 }
 0x157   : > { %v3241_v14 = vadd.f32 %v2297_v13, %v2296_v11  ;;  %v2274_v6 = vadd.f32 %v2273_v12, %v2272_v10 }
 0x158   : > { %v2275_v15 = vpop.f32.mrf.mxu0  ;;  %v2299_v16 = vpop.f32.mrf.mxu1 }
 0x15a   : > { %v2276_v17 = vpop.f32.mrf.mxu0  ;;  %v2300_v18 = vpop.f32.mrf.mxu1 }
 0x15b   : > { %v3243_v19 = vadd.f32 %v2300_v18, %v2299_v16 }
 0x15c   : > { %v2278_v20 = vpop.f32.mrf.mxu0  ;;  %v2302_v21 = vpop.f32.mrf.mxu1 }
 0x15e   : > { %v2279_v22 = vpop.f32.mrf.mxu0  ;;  %v2303_v23 = vpop.f32.mrf.mxu1 }
 0x15f   : > { %v3245_v24 = vadd.f32 %v2303_v23, %v2302_v21  ;;  %v2277_v21 = vadd.f32 %v2276_v17, %v2275_v15 }
 0x160   : > { %v2281_v25 = vpop.f32.mrf.mxu0  ;;  %v2305_v26 = vpop.f32.mrf.mxu1 }
 0x162   : > { %v2282_v27 = vpop.f32.mrf.mxu0  ;;  %v2306_v28 = vpop.f32.mrf.mxu1 }
 0x163   : > { %v3247_v29 = vadd.f32 %v2306_v28, %v2305_v26 }
 0x164   : > { %v2284_v30 = vpop.f32.mrf.mxu0  ;;  %v2308_v31 = vpop.f32.mrf.mxu1 }
 0x166   : > { %v2285_v32 = vpop.f32.mrf.mxu0  ;;  %v2309_v33 = vpop.f32.mrf.mxu1 }
 0x167   : > { %v3249_v34 = vadd.f32 %v2309_v33, %v2308_v31  ;;  %v2280_v33 = vadd.f32 %v2279_v22, %v2278_v20  ;;  %v2286_v17 = vadd.f32 %v2285_v32, %v2284_v30 }
 0x168   : > { %v3251_v35 = vpop.f32.mrf.mxu0  ;;  %v2311_v36 = vpop.f32.mrf.mxu1 }
 0x16a   : > { %v3253_v37 = vpop.f32.mrf.mxu0  ;;  %v2312_v38 = vpop.f32.mrf.mxu1 }
 0x16b   : > { %v3255_v39 = vadd.f32 %v2312_v38, %v2311_v36  ;;  %v2289_v30 = vadd.f32 %v3253_v37, %v3251_v35 }
 0x16c   : > { %v2330_v40 = vpop.f32.mrf.mxu1  ;;  %v2394_v41 = vpop.f32.mrf.mxu0 }
 0x16e   : > { %v2331_v42 = vpop.f32.mrf.mxu1  ;;  %v2395_v43 = vpop.f32.mrf.mxu0 }
 0x16f   : > { %v2332_v58 = vadd.f32 %v2331_v42, %v2330_v40  ;;  %v2396_v28 = vadd.f32 %v2395_v43, %v2394_v41  ;;  %v2283_v40 = vadd.f32 %v2282_v27, %v2281_v25 }
 0x170   : > { %v2333_v44 = vpop.f32.mrf.mxu1  ;;  %v2397_v45 = vpop.f32.mrf.mxu0 }
 0x171   : > { %v1491_v11 = vadd.f32 %v2332_v58, %v2268_v62 }
 0x172   : > { %v2334_v46 = vpop.f32.mrf.mxu1  ;;  %v2398_v47 = vpop.f32.mrf.mxu0 }
 0x173   : > { %v2335_v54 = vadd.f32 %v2334_v46, %v2333_v44  ;;  %v2399_v13 = vadd.f32 %v2398_v47, %v2397_v45  ;;  %v3259_v38 = vadd.f32 %v2396_v28, %v1491_v11 }
 0x174   : > { %v2336_v48 = vpop.f32.mrf.mxu1  ;;  %v2400_v49 = vpop.f32.mrf.mxu0 }
 0x175   : > { %v1494_v63 = vadd.f32 %v2335_v54, %v2271_v57 }
 0x176   : > { %v2337_v50 = vpop.f32.mrf.mxu1  ;;  %v2401_v51 = vpop.f32.mrf.mxu0 }
 0x177   : > { %v2338_v61 = vadd.f32 %v2337_v50, %v2336_v48  ;;  %v3257_v31 = vadd.f32 %v2399_v13, %v1494_v63  ;;  %v2402_v36 = vadd.f32 %v2401_v51, %v2400_v49 }
 0x178   : > { %v2339_v52 = vpop.f32.mrf.mxu1  ;;  %v2403_v53 = vpop.f32.mrf.mxu0 }
 0x179   : > { %v1499_v23 = vadd.f32 %v2338_v61, %v2274_v6  ;;  %v1650_v41 = vadd.f32 %v3257_v31, %v3259_v38 }
 0x17a   : > { %v2340_v55 = vpop.f32.mrf.mxu1  ;;  %v2404_v56 = vpop.f32.mrf.mxu0 }
 0x17b   : > { %v2341_v8 = vadd.f32 %v2340_v55, %v2339_v52  ;;  %v3261_v42 = vadd.f32 %v2402_v36, %v1499_v23  ;;  %v2405_v44 = vadd.f32 %v2404_v56, %v2403_v53 }
 0x17c   : > { %v2342_v59 = vpop.f32.mrf.mxu1  ;;  %v2406_v60 = vpop.f32.mrf.mxu0 }
 0x17d   : > { %v1502_v0 = vadd.f32 %v2341_v8, %v2277_v21  ;;  %v1651_v50 = vadd.f32 %v1650_v41, %v3261_v42 }
 0x17e   : > { %v2343_v1 = vpop.f32.mrf.mxu1  ;;  %v2407_v3 = vpop.f32.mrf.mxu0 }
 0x17f   : > { %v2344_v26 = vadd.f32 %v2343_v1, %v2342_v59  ;;  %v3265_v46 = vadd.f32 %v2405_v44, %v1502_v0  ;;  %v2408_v20 = vadd.f32 %v2407_v3, %v2406_v60 }
 0x180   : > { %v2345_v16 = vpop.f32.mrf.mxu1  ;;  %v2409_v18 = vpop.f32.mrf.mxu0 }
 0x181   : > { %v1507_v15 = vadd.f32 %v2344_v26, %v2280_v33  ;;  %v1652_v53 = vadd.f32 %v1651_v50, %v3265_v46 }
 0x182   : > { %v2346_v5 = vpop.f32.mrf.mxu1  ;;  %v2410_v7 = vpop.f32.mrf.mxu0 }
 0x183   : > { %v2347_v2 = vadd.f32 %v2346_v5, %v2345_v16  ;;  %v3268_v25 = vadd.f32 %v2408_v20, %v1507_v15  ;;  %v2411_v27 = vadd.f32 %v2410_v7, %v2409_v18 }
 0x184   : > { %v2348_v10 = vpop.f32.mrf.mxu1  ;;  %v2412_v12 = vpop.f32.mrf.mxu0 }
 0x185   : > { %v1510_v22 = vadd.f32 %v2347_v2, %v2283_v40  ;;  %v1653_v59 = vadd.f32 %v1652_v53, %v3268_v25 }
 0x186   : > { %v2349_v43 = vpop.f32.mrf.mxu1  ;;  %v2413_v45 = vpop.f32.mrf.mxu0 }
 0x187   : > { %v2350_v47 = vadd.f32 %v2349_v43, %v2348_v10  ;;  %v3273_v54 = vadd.f32 %v2411_v27, %v1510_v22  ;;  %v2414_v55 = vadd.f32 %v2413_v45, %v2412_v12 }
 0x188   : > { %v2351_v48 = vpop.f32.mrf.mxu1  ;;  %v2415_v49 = vpop.f32.mrf.mxu0 }
 0x189   : > { %v1515_v51 = vadd.f32 %v2350_v47, %v2286_v17  ;;  %v1654_v35 = vadd.f32 %v1653_v59, %v3273_v54 }
 0x18a   : > { %v2352_v32 = vpop.f32.mrf.mxu1  ;;  %v2416_v52 = vpop.f32.mrf.mxu0 }
 0x18b   : > { %v2353_v56 = vadd.f32 %v2352_v32, %v2351_v48  ;;  %v3276_v60 = vadd.f32 %v2414_v55, %v1515_v51  ;;  %v2417_v62 = vadd.f32 %v2416_v52, %v2415_v49 }
 0x18c   : > { %v2354_v57 = vpop.f32.mrf.mxu1  ;;  %v2418_v58 = vpop.f32.mrf.mxu0 }
 0x18d   : > { %v1518_v61 = vadd.f32 %v2353_v56, %v2289_v30  ;;  %v1655_v11 = vadd.f32 %v1654_v35, %v3276_v60 }
 0x18e   : > { %v2355_v63 = vpop.f32.mrf.mxu1  ;;  %v2419_v1 = vpop.f32.mrf.mxu0 }
 0x18f   : > { %v3279_v37 = vadd.f32 %v2417_v62, %v1518_v61  ;;  %v2356_v3 = vadd.f32 %v2355_v63, %v2354_v57  ;;  %v2420_v16 = vadd.f32 %v2419_v1, %v2418_v58 }
 0x190   : > { %v2357_v6 = vpop.f32.mrf.mxu1  ;;  %v2421_v8 = vpop.f32.mrf.mxu0 }
 0x191   : > { %v1523_v13 = vadd.f32 %v2356_v3, %v3237_v4  ;;  %v1656_v23 = vadd.f32 %v1655_v11, %v3279_v37 }
 0x192   : > { %v2358_v18 = vpop.f32.mrf.mxu1  ;;  %v2422_v21 = vpop.f32.mrf.mxu0 }
 0x193   : > { %v3284_v26 = vadd.f32 %v2420_v16, %v1523_v13  ;;  %v2359_v28 = vadd.f32 %v2358_v18, %v2357_v6  ;;  %v2423_v0 = vadd.f32 %v2422_v21, %v2421_v8 }
 0x194   : > { %v2360_v5 = vpop.f32.mrf.mxu1  ;;  %v2424_v7 = vpop.f32.mrf.mxu0 }
 0x195   : > { %v1657_v33 = vadd.f32 %v1656_v23, %v3284_v26  ;;  %v1526_v36 = vadd.f32 %v2359_v28, %v3239_v9 }
 0x196   : > { %v2361_v2 = vpop.f32.mrf.mxu1  ;;  %v2425_v10 = vpop.f32.mrf.mxu0 }
 0x197   : > { %v1623_v12 = vadd.f32 %v2423_v0, %v1526_v36  ;;  %v2362_v40 = vadd.f32 %v2361_v2, %v2360_v5  ;;  %v2426_v41 = vadd.f32 %v2425_v10, %v2424_v7 }
 0x198   : > { %v2363_v4 = vpop.f32.mrf.mxu1  ;;  %v2427_v44 = vpop.f32.mrf.mxu0 }
 0x199   : > { %v1658_v15 = vadd.f32 %v1657_v33, %v1623_v12  ;;  %v1531_v17 = vadd.f32 %v2362_v40, %v3241_v14 }
 0x19a   : > { %v2364_v43 = vpop.f32.mrf.mxu1  ;;  %v2428_v45 = vpop.f32.mrf.mxu0 }
 0x19b   : > { %v1628_v20 = vadd.f32 %v2426_v41, %v1531_v17  ;;  %v2365_v22 = vadd.f32 %v2364_v43, %v2363_v4  ;;  %v2429_v50 = vadd.f32 %v2428_v45, %v2427_v44 }
 0x19c   : > { %v2366_v47 = vpop.f32.mrf.mxu1  ;;  %v2430_v48 = vpop.f32.mrf.mxu0 }
 0x19d   : > { %v1659_v49 = vadd.f32 %v1658_v15, %v1628_v20  ;;  %v1534_v9 = vadd.f32 %v2365_v22, %v3243_v19 }
 0x19e   : > { %v2367_v27 = vpop.f32.mrf.mxu1  ;;  %v2431_v51 = vpop.f32.mrf.mxu0 }
 0x19f   : > { %v1631_v30 = vadd.f32 %v2429_v50, %v1534_v9  ;;  %v2368_v32 = vadd.f32 %v2367_v27, %v2366_v47  ;;  %v2432_v56 = vadd.f32 %v2431_v51, %v2430_v48 }
 0x1a0   : > { %v2369_v52 = vpop.f32.mrf.mxu1  ;;  %v2433_v53 = vpop.f32.mrf.mxu0 }
 0x1a1   : > { %v1660_v55 = vadd.f32 %v1659_v49, %v1631_v30  ;;  %v1539_v14 = vadd.f32 %v2368_v32, %v3245_v24 }
 0x1a2   : > { %v2370_v57 = vpop.f32.mrf.mxu1  ;;  %v2434_v58 = vpop.f32.mrf.mxu0 }
 0x1a3   : > { %v1636_v59 = vadd.f32 %v2432_v56, %v1539_v14  ;;  %v2371_v61 = vadd.f32 %v2370_v57, %v2369_v52  ;;  %v2435_v35 = vadd.f32 %v2434_v58, %v2433_v53 }
 0x1a4   : > { %v2372_v62 = vpop.f32.mrf.mxu1  ;;  %v2436_v63 = vpop.f32.mrf.mxu0 }
 0x1a5   : > { %v1661_v1 = vadd.f32 %v1660_v55, %v1636_v59  ;;  %v1542_v19 = vadd.f32 %v2371_v61, %v3247_v29 }
 0x1a6   : > { %v2373_v3 = vpop.f32.mrf.mxu1  ;;  %v2437_v6 = vpop.f32.mrf.mxu0 }
 0x1a7   : > { %v1639_v8 = vadd.f32 %v2435_v35, %v1542_v19  ;;  %v2374_v11 = vadd.f32 %v2373_v3, %v2372_v62  ;;  %v2438_v21 = vadd.f32 %v2437_v6, %v2436_v63 }
 0x1a8   : > { %v2375_v13 = vpop.f32.mrf.mxu1  ;;  %v2439_v16 = vpop.f32.mrf.mxu0 }
 0x1a9   : > { %v1662_v18 = vadd.f32 %v1661_v1, %v1639_v8  ;;  %v1547_v24 = vadd.f32 %v2374_v11, %v3249_v34 }
 0x1aa   : > { %v2376_v23 = vpop.f32.mrf.mxu1  ;;  %v2440_v28 = vpop.f32.mrf.mxu0 }
 0x1ab   : > { %v1644_v5 = vadd.f32 %v2438_v21, %v1547_v24  ;;  %v2377_v7 = vadd.f32 %v2376_v23, %v2375_v13  ;;  %v2441_v0 = vadd.f32 %v2440_v28, %v2439_v16 }
 0x1ad   : > { %v1663_v33 = vadd.f32 %v1662_v18, %v1644_v5  ;;  %v1550_v36 = vadd.f32 %v2377_v7, %v3255_v39 }
 0x1af   : > { %v1647_v29 = vadd.f32 %v2441_v0, %v1550_v36 }
 0x1b1   : > { %v1664_v2 = vadd.f32 %v1663_v33, %v1647_v29 }
 0x1b3   : > { %v1665_v10 = vrot.slane %v1664_v2, 4 }
 0x1b5   : > { %v1666_v40 = vadd.f32 %v1665_v10, %v1664_v2 }
 0x1b7   : > { %v1667_v4 = vrot.slane %v1666_v40, 2 }
 0x1b9   : > { %v1668_v44 = vadd.f32 %v1667_v4, %v1666_v40 }
 0x1bb   : > { %v1669_v15 = vrot.slane %v1668_v44, 1 }
 0x1bd   : > { %v1670_v17 = vadd.f32 %v1669_v15, %v1668_v44 }
 0x1bf   : > { %v1672_v41 = vmul.f32 0.0078125, %v1670_v17 }
 0x1c1   : > { %v1673_v34 = vsub.f32 %v3259_v38, %v1672_v41  ;;  %v1674_v43 = vsub.f32 %v3257_v31, %v1672_v41  ;;  %v3297_v45 = vsub.f32 %v3284_v26, %v1672_v41  ;;  %v3299_v22 = vsub.f32 %v1623_v12, %v1672_v41 }
 0x1c2   : > { %v3301_v39 = vsub.f32 %v1628_v20, %v1672_v41  ;;  %v3303_v47 = vsub.f32 %v1631_v30, %v1672_v41  ;;  %v3305_v48 = vsub.f32 %v1636_v59, %v1672_v41  ;;  %v3307_v49 = vsub.f32 %v1639_v8, %v1672_v41 }
 0x1c3   : > { %v3309_v9 = vsub.f32 %v1644_v5, %v1672_v41  ;;  %v3311_v50 = vsub.f32 %v1647_v29, %v1672_v41  ;;  %v1675_v38 = vsub.f32 %v3261_v42, %v1672_v41  ;;  %v1689_v31 = vmul.f32 %v1673_v34, %v1673_v34 }
 0x1c4   : > { %v1690_v27 = vmul.f32 %v1674_v43, %v1674_v43  ;;  %v1676_v26 = vsub.f32 %v3265_v46, %v1672_v41  ;;  %v1677_v12 = vsub.f32 %v3268_v25, %v1672_v41  ;;  %v1678_v30 = vsub.f32 %v3273_v54, %v1672_v41 }
 0x1c5   : > { %v1691_v20 = vmul.f32 %v1675_v38, %v1675_v38  ;;  %v1679_v53 = vsub.f32 %v3276_v60, %v1672_v41  ;;  %v1680_v56 = vsub.f32 %v3279_v37, %v1672_v41  ;;  %v1697_v25 = vmul.f32 %v3297_v45, %v3297_v45 }
 0x1c6   : > { %v1705_v51 = vadd.f32 %v1690_v27, %v1689_v31  ;;  %v1692_v32 = vmul.f32 %v1676_v26, %v1676_v26  ;;  %v1693_v55 = vmul.f32 %v1677_v12, %v1677_v12  ;;  %v1694_v57 = vmul.f32 %v1678_v30, %v1678_v30  ;;  %v2202_v31 = vld [vmem:[%s3033_s13] ss:$0 sm:$0xff] }
 0x1c7   : > { %v1695_v58 = vmul.f32 %v1679_v53, %v1679_v53  ;;  %v1696_v61 = vmul.f32 %v1680_v56, %v1680_v56  ;;  %v1698_v54 = vmul.f32 %v3299_v22, %v3299_v22  ;;  %v1699_v60 = vmul.f32 %v3301_v39, %v3301_v39 }
 0x1c8   : > { %v1706_v52 = vadd.f32 %v1705_v51, %v1691_v20  ;;  %v1700_v37 = vmul.f32 %v3303_v47, %v3303_v47  ;;  %v1701_v35 = vmul.f32 %v3305_v48, %v3305_v48  ;;  %v1702_v6 = vmul.f32 %v3307_v49, %v3307_v49 }
 0x1c9   : > { %v1703_v11 = vmul.f32 %v3309_v9, %v3309_v9  ;;  %v1704_v16 = vmul.f32 %v3311_v50, %v3311_v50 }
 0x1ca   : > { %v1707_v14 = vadd.f32 %v1706_v52, %v1692_v32 }
 0x1cc   : > { %v1708_v42 = vadd.f32 %v1707_v14, %v1693_v55 }
 0x1ce   : > { %v1709_v59 = vadd.f32 %v1708_v42, %v1694_v57 }
 0x1d0   : > { %v1710_v46 = vadd.f32 %v1709_v59, %v1695_v58 }
 0x1d2   : > { %v1711_v62 = vadd.f32 %v1710_v46, %v1696_v61 }
 0x1d4   : > { %v1712_v63 = vadd.f32 %v1711_v62, %v1697_v25 }
 0x1d6   : > { %v1713_v1 = vadd.f32 %v1712_v63, %v1698_v54 }
 0x1d8   : > { %v1714_v19 = vadd.f32 %v1713_v1, %v1699_v60 }
 0x1da   : > { %v1715_v3 = vadd.f32 %v1714_v19, %v1700_v37 }
 0x1dc   : > { %v1716_v8 = vadd.f32 %v1715_v3, %v1701_v35 }
 0x1de   : > { %v1717_v13 = vadd.f32 %v1716_v8, %v1702_v6 }
 0x1e0   : > { %v1718_v18 = vadd.f32 %v1717_v13, %v1703_v11 }
 0x1e2   : > { %v1719_v24 = vadd.f32 %v1718_v18, %v1704_v16 }
 0x1e4   : > { %v1720_v21 = vrot.slane %v1719_v24, 4 }
 0x1e6   : > { %v1721_v23 = vadd.f32 %v1720_v21, %v1719_v24 }
 0x1e8   : > { %v1722_v28 = vrot.slane %v1721_v23, 2 }
 0x1ea   : > { %v1723_v5 = vadd.f32 %v1722_v28, %v1721_v23 }
 0x1ec   : > { %v1724_v7 = vrot.slane %v1723_v5, 1 }
 0x1ee   : > { %v1725_v33 = vadd.f32 %v1724_v7, %v1723_v5 }
 0x1f0   : > { %v1726_v36 = vmul.f32 0.0078125, %v1725_v33 }
 0x1f2   : > { %v1727_v0 = vadd.f32 1e-05, %v1726_v36 }
 0x1f4   : > { %2638 = vrsqrt.f32 %v1727_v0 }
 0x201   : > { %v2639_v29 = vpop.eup %2638 }
 0x202   : > { %v1729_v2 = vmul.f32 %v2639_v29, %v1673_v34  ;;  %v1730_v10 = vmul.f32 %v2639_v29, %v1674_v43  ;;  %v1731_v40 = vmul.f32 %v2639_v29, %v1675_v38  ;;  %v1732_v4 = vmul.f32 %v2639_v29, %v1676_v26 }
 0x203   : > { %v1733_v44 = vmul.f32 %v2639_v29, %v1677_v12  ;;  %v1734_v15 = vmul.f32 %v2639_v29, %v1678_v30  ;;  %v1735_v17 = vmul.f32 %v2639_v29, %v1679_v53  ;;  %v1736_v41 = vmul.f32 %v2639_v29, %v1680_v56  ;;  %v2203_v56 = vld [vmem:[%s3038_s16] ss:$0 sm:$0xff] }
 0x204   : > { %v1737_v27 = vmul.f32 %v2639_v29, %v3297_v45  ;;  %v1738_v20 = vmul.f32 %v2639_v29, %v3299_v22  ;;  %v1739_v51 = vmul.f32 %v2639_v29, %v3301_v39  ;;  %v1740_v32 = vmul.f32 %v2639_v29, %v3303_v47 }
 0x205   : > { %v1741_v52 = vmul.f32 %v2639_v29, %v3305_v48  ;;  %v1742_v34 = vmul.f32 %v2639_v29, %v3307_v49  ;;  %v1743_v43 = vmul.f32 %v2639_v29, %v3309_v9  ;;  %v1744_v38 = vmul.f32 %v2639_v29, %v3311_v50 }
 0x206   : > { %v1752_v26 = vmul.f32 %v2202_v31, %v1729_v2  ;;  %v1753_v12 = vmul.f32 %v2202_v31, %v1730_v10  ;;  %v1754_v30 = vmul.f32 %v2202_v31, %v1731_v40  ;;  %v1755_v53 = vmul.f32 %v2202_v31, %v1732_v4 }
 0x207   : > { %v1756_v45 = vmul.f32 %v2202_v31, %v1733_v44  ;;  %v1757_v55 = vmul.f32 %v2202_v31, %v1734_v15  ;;  %v1758_v14 = vmul.f32 %v2202_v31, %v1735_v17  ;;  %v1759_v22 = vmul.f32 %v2202_v31, %v1736_v41 }
 0x208   : > { %v1760_v39 = vmul.f32 %v2202_v31, %v1737_v27  ;;  %v1761_v57 = vmul.f32 %v2202_v31, %v1738_v20  ;;  %v1762_v47 = vmul.f32 %v2202_v31, %v1739_v51  ;;  %v1763_v42 = vmul.f32 %v2202_v31, %v1740_v32 }
 0x209   : > { %v1764_v48 = vmul.f32 %v2202_v31, %v1741_v52  ;;  %v1765_v49 = vmul.f32 %v2202_v31, %v1742_v34  ;;  %v1766_v9 = vmul.f32 %v2202_v31, %v1743_v43  ;;  %v1767_v50 = vmul.f32 %v2202_v31, %v1744_v38 }
 0x20a   : > { %v1775_v58 = vadd.f32 %v2203_v56, %v1752_v26  ;;  %v1776_v59 = vadd.f32 %v2203_v56, %v1753_v12  ;;  %v1777_v61 = vadd.f32 %v2203_v56, %v1754_v30  ;;  %v1778_v46 = vadd.f32 %v2203_v56, %v1755_v53 }
 0x20b   : > { %v1779_v25 = vadd.f32 %v2203_v56, %v1756_v45  ;;  %v1780_v62 = vadd.f32 %v2203_v56, %v1757_v55  ;;  %v1781_v54 = vadd.f32 %v2203_v56, %v1758_v14  ;;  %v1782_v63 = vadd.f32 %v2203_v56, %v1759_v22 }
 0x20c   : > { %v1783_v60 = vadd.f32 %v2203_v56, %v1760_v39  ;;  %v1784_v1 = vadd.f32 %v2203_v56, %v1761_v57  ;;  %v1785_v37 = vadd.f32 %v2203_v56, %v1762_v47  ;;  %v1786_v19 = vadd.f32 %v2203_v56, %v1763_v42  ;;  %1791 = vst [vmem:[%s3042_s25] sm:$0xff] %v1775_v58 }
 0x20d   : > { %1792 = vst [vmem:[%s3042_s25 + $0x8] sm:$0xff] %v1776_v59  ;;  %1793 = vst [vmem:[%s3042_s25 + $0x10] sm:$0xff] %v1777_v61  ;;  %v1787_v35 = vadd.f32 %v2203_v56, %v1764_v48  ;;  %v1788_v3 = vadd.f32 %v2203_v56, %v1765_v49  ;;  %v1789_v6 = vadd.f32 %v2203_v56, %v1766_v9 }
 0x20e   : > { %1794 = vst [vmem:[%s3042_s25 + $0x18] sm:$0xff] %v1778_v46  ;;  %v1790_v8 = vadd.f32 %v2203_v56, %v1767_v50  ;;  %1795 = vst [vmem:[%s3042_s25 + $0x20] sm:$0xff] %v1779_v25 }
 0x20f   : > { %1796 = vst [vmem:[%s3042_s25 + $0x28] sm:$0xff] %v1780_v62  ;;  %1797 = vst [vmem:[%s3042_s25 + $0x30] sm:$0xff] %v1781_v54 }
 0x210   : > { %1798 = vst [vmem:[%s3042_s25 + $0x38] sm:$0xff] %v1782_v63  ;;  %1799 = vst [vmem:[%s3042_s25 + $0x40] sm:$0xff] %v1783_v60 }
 0x211   : > { %1800 = vst [vmem:[%s3042_s25 + $0x48] sm:$0xff] %v1784_v1  ;;  %1801 = vst [vmem:[%s3042_s25 + $0x50] sm:$0xff] %v1785_v37 }
 0x212   : > { %1802 = vst [vmem:[%s3042_s25 + $0x58] sm:$0xff] %v1786_v19  ;;  %1803 = vst [vmem:[%s3042_s25 + $0x60] sm:$0xff] %v1787_v35 }
 0x213   : > { %1804 = vst [vmem:[%s3042_s25 + $0x68] sm:$0xff] %v1788_v3  ;;  %1805 = vst [vmem:[%s3042_s25 + $0x70] sm:$0xff] %v1789_v6 }
 0x214   : > { %1806 = vst [vmem:[%s3042_s25 + $0x78] sm:$0xff] %v1790_v8 }
 0x215 PF: > { %p2204_p5 = scmp.ne.s32.totalorder %s2785_s24, 3 }
 0x217   : > { %1810 = sbr.rel (%p2204_p5) target bundleno = 668 (0x29c), region = 89 }
 0x21c   : > { %v2212_v11 = vld [vmem:[%s3492_s1] sm:$0xff]   ;;  %v2243_v13 = vld [vmem:[%s3492_s1 + $0x8] sm:$0xff]   ;;  %v2244_v21 = vld [vmem:[%s3492_s1 + $0x10] sm:$0xff]  }
 0x21d   : > { %v2213_v16 = vunpack.c.l.bf16 %v2212_v11  ;;  %v2214_v18 = vunpack.c.h.bf16 %v2212_v11  ;;  %v2217_v24 = vunpack.c.l.bf16 %v2243_v13  ;;  %v2218_v23 = vunpack.c.h.bf16 %v2243_v13  ;;  %v2245_v33 = vld [vmem:[%s3492_s1 + $0x18] sm:$0xff]   ;;  %v2246_v10 = vld [vmem:[%s3492_s1 + $0x20] sm:$0xff]   ;;  %v2247_v17 = vld [vmem:[%s3492_s1 + $0x28] sm:$0xff]  }
 0x21e   : > { %v2221_v5 = vunpack.c.l.bf16 %v2244_v21  ;;  %v2222_v36 = vunpack.c.h.bf16 %v2244_v21  ;;  %v2225_v29 = vunpack.c.l.bf16 %v2245_v33  ;;  %v2226_v40 = vunpack.c.h.bf16 %v2245_v33  ;;  %v2248_v51 = vld [vmem:[%s3492_s1 + $0x30] sm:$0xff]   ;;  %v2249_v38 = vld [vmem:[%s3492_s1 + $0x38] sm:$0xff]  }
 0x21f   : > { %v1843_v28 = vadd.f32 %v2214_v18, %v2213_v16  ;;  %v2229_v44 = vunpack.c.l.bf16 %v2246_v10  ;;  %v2230_v41 = vunpack.c.h.bf16 %v2246_v10  ;;  %v2233_v27 = vunpack.c.l.bf16 %v2247_v17 }
 0x220   : > { %v2234_v32 = vunpack.c.h.bf16 %v2247_v17  ;;  %v2237_v34 = vunpack.c.l.bf16 %v2248_v51  ;;  %v2238_v26 = vunpack.c.h.bf16 %v2248_v51  ;;  %v2241_v30 = vunpack.c.l.bf16 %v2249_v38 }
 0x221   : > { %v1844_v7 = vadd.f32 %v2217_v24, %v1843_v28  ;;  %v2242_v45 = vunpack.c.h.bf16 %v2249_v38 }
 0x223   : > { %v1845_v0 = vadd.f32 %v2218_v23, %v1844_v7 }
 0x225   : > { %v1846_v2 = vadd.f32 %v2221_v5, %v1845_v0 }
 0x227   : > { %v1847_v4 = vadd.f32 %v2222_v36, %v1846_v2 }
 0x229   : > { %v1848_v15 = vadd.f32 %v2225_v29, %v1847_v4 }
 0x22b   : > { %v1849_v31 = vadd.f32 %v2226_v40, %v1848_v15 }
 0x22d   : > { %v1850_v20 = vadd.f32 %v2229_v44, %v1849_v31 }
 0x22f   : > { %v1851_v52 = vadd.f32 %v2230_v41, %v1850_v20 }
 0x231   : > { %v1852_v43 = vadd.f32 %v2233_v27, %v1851_v52 }
 0x233   : > { %v1853_v12 = vadd.f32 %v2234_v32, %v1852_v43 }
 0x235   : > { %v1854_v53 = vadd.f32 %v2237_v34, %v1853_v12 }
 0x237   : > { %v1855_v55 = vadd.f32 %v2238_v26, %v1854_v53 }
 0x239   : > { %v1856_v14 = vadd.f32 %v2241_v30, %v1855_v55 }
 0x23b   : > { %v1857_v22 = vadd.f32 %v2242_v45, %v1856_v14 }
 0x23d   : > { %v1858_v56 = vrot.slane %v1857_v22, 4 }
 0x23f   : > { %v1859_v39 = vadd.f32 %v1858_v56, %v1857_v22  ;;  %v2205_v22 = vld [vmem:[%s3033_s13] ss:$0 sm:$0xff] }
 0x241   : > { %v1860_v57 = vrot.slane %v1859_v39, 2 }
 0x243   : > { %v1861_v47 = vadd.f32 %v1860_v57, %v1859_v39 }
 0x245   : > { %v1862_v42 = vrot.slane %v1861_v47, 1 }
 0x247   : > { %v1863_v48 = vadd.f32 %v1862_v42, %v1861_v47  ;;  %v2206_v42 = vld [vmem:[%s3038_s16] ss:$0 sm:$0xff] }
 0x249   : > { %v1865_v49 = vmul.f32 0.0078125, %v1863_v48 }
 0x24b   : > { %v1866_v9 = vsub.f32 %v2213_v16, %v1865_v49  ;;  %v1867_v50 = vsub.f32 %v2214_v18, %v1865_v49  ;;  %v1868_v58 = vsub.f32 %v2217_v24, %v1865_v49  ;;  %v1869_v59 = vsub.f32 %v2218_v23, %v1865_v49 }
 0x24c   : > { %v1870_v25 = vsub.f32 %v2221_v5, %v1865_v49  ;;  %v1871_v54 = vsub.f32 %v2222_v36, %v1865_v49  ;;  %v1872_v1 = vsub.f32 %v2225_v29, %v1865_v49  ;;  %v1873_v35 = vsub.f32 %v2226_v40, %v1865_v49 }
 0x24d   : > { %v1882_v61 = vmul.f32 %v1866_v9, %v1866_v9  ;;  %v1883_v46 = vmul.f32 %v1867_v50, %v1867_v50  ;;  %v1884_v62 = vmul.f32 %v1868_v58, %v1868_v58  ;;  %v1885_v63 = vmul.f32 %v1869_v59, %v1869_v59 }
 0x24e   : > { %v1886_v37 = vmul.f32 %v1870_v25, %v1870_v25  ;;  %v1887_v3 = vmul.f32 %v1871_v54, %v1871_v54  ;;  %v3386_v8 = vsub.f32 %v2229_v44, %v1865_v49  ;;  %v1888_v11 = vmul.f32 %v1872_v1, %v1872_v1 }
 0x24f   : > { %v1898_v60 = vadd.f32 %v1883_v46, %v1882_v61  ;;  %v3388_v16 = vsub.f32 %v2230_v41, %v1865_v49  ;;  %v1889_v18 = vmul.f32 %v1873_v35, %v1873_v35  ;;  %v3390_v21 = vsub.f32 %v2233_v27, %v1865_v49 }
 0x250   : > { %v1890_v23 = vmul.f32 %v3386_v8, %v3386_v8  ;;  %v3394_v5 = vsub.f32 %v2234_v32, %v1865_v49  ;;  %v3398_v36 = vsub.f32 %v2237_v34, %v1865_v49  ;;  %v3402_v2 = vsub.f32 %v2238_v26, %v1865_v49 }
 0x251   : > { %v1899_v19 = vadd.f32 %v1898_v60, %v1884_v62  ;;  %v1891_v7 = vmul.f32 %v3388_v16, %v3388_v16  ;;  %v1892_v0 = vmul.f32 %v3390_v21, %v3390_v21  ;;  %v1880_v4 = vsub.f32 %v2241_v30, %v1865_v49 }
 0x252   : > { %v1893_v10 = vmul.f32 %v3394_v5, %v3394_v5  ;;  %v1894_v44 = vmul.f32 %v3398_v36, %v3398_v36  ;;  %v1881_v17 = vsub.f32 %v2242_v45, %v1865_v49  ;;  %v1895_v41 = vmul.f32 %v3402_v2, %v3402_v2 }
 0x253   : > { %v1900_v6 = vadd.f32 %v1899_v19, %v1885_v63  ;;  %v1896_v27 = vmul.f32 %v1880_v4, %v1880_v4 }
 0x254   : > { %v1897_v51 = vmul.f32 %v1881_v17, %v1881_v17 }
 0x255   : > { %v1901_v13 = vadd.f32 %v1900_v6, %v1886_v37 }
 0x257   : > { %v1902_v24 = vadd.f32 %v1901_v13, %v1887_v3 }
 0x259   : > { %v1903_v28 = vadd.f32 %v1902_v24, %v1888_v11 }
 0x25b   : > { %v1904_v33 = vadd.f32 %v1903_v28, %v1889_v18 }
 0x25d   : > { %v1905_v29 = vadd.f32 %v1904_v33, %v1890_v23 }
 0x25f   : > { %v1906_v40 = vadd.f32 %v1905_v29, %v1891_v7 }
 0x261   : > { %v1907_v15 = vadd.f32 %v1906_v40, %v1892_v0 }
 0x263   : > { %v1908_v31 = vadd.f32 %v1907_v15, %v1893_v10 }
 0x265   : > { %v1909_v20 = vadd.f32 %v1908_v31, %v1894_v44 }
 0x267   : > { %v1910_v32 = vadd.f32 %v1909_v20, %v1895_v41 }
 0x269   : > { %v1911_v52 = vadd.f32 %v1910_v32, %v1896_v27 }
 0x26b   : > { %v1912_v34 = vadd.f32 %v1911_v52, %v1897_v51 }
 0x26d   : > { %v1913_v43 = vrot.slane %v1912_v34, 4 }
 0x26f   : > { %v1914_v38 = vadd.f32 %v1913_v43, %v1912_v34 }
 0x271   : > { %v1915_v26 = vrot.slane %v1914_v38, 2 }
 0x273   : > { %v1916_v12 = vadd.f32 %v1915_v26, %v1914_v38 }
 0x275   : > { %v1917_v30 = vrot.slane %v1916_v12, 1 }
 0x277   : > { %v1918_v53 = vadd.f32 %v1917_v30, %v1916_v12 }
 0x279   : > { %v1919_v55 = vmul.f32 0.0078125, %v1918_v53 }
 0x27b   : > { %v1920_v45 = vadd.f32 1e-05, %v1919_v55 }
 0x27d   : > { %2640 = vrsqrt.f32 %v1920_v45 }
 0x28a   : > { %v2641_v14 = vpop.eup %2640 }
 0x28b   : > { %v1922_v56 = vmul.f32 %v2641_v14, %v1866_v9  ;;  %v1923_v39 = vmul.f32 %v2641_v14, %v1867_v50  ;;  %v1924_v57 = vmul.f32 %v2641_v14, %v1868_v58  ;;  %v1925_v47 = vmul.f32 %v2641_v14, %v1869_v59 }
 0x28c   : > { %v1926_v48 = vmul.f32 %v2641_v14, %v1870_v25  ;;  %v1927_v49 = vmul.f32 %v2641_v14, %v1871_v54  ;;  %v1928_v61 = vmul.f32 %v2641_v14, %v1872_v1  ;;  %v1929_v46 = vmul.f32 %v2641_v14, %v1873_v35 }
 0x28d   : > { %v1945_v62 = vmul.f32 %v2205_v22, %v1922_v56  ;;  %v1946_v63 = vmul.f32 %v2205_v22, %v1923_v39  ;;  %v1947_v60 = vmul.f32 %v2205_v22, %v1924_v57  ;;  %v1948_v37 = vmul.f32 %v2205_v22, %v1925_v47 }
 0x28e   : > { %v1949_v19 = vmul.f32 %v2205_v22, %v1926_v48  ;;  %v1950_v3 = vmul.f32 %v2205_v22, %v1927_v49  ;;  %v1951_v6 = vmul.f32 %v2205_v22, %v1928_v61  ;;  %v1952_v9 = vmul.f32 %v2205_v22, %v1929_v46 }
 0x28f   : > { %v1968_v50 = vadd.f32 %v2206_v42, %v1945_v62  ;;  %v1969_v58 = vadd.f32 %v2206_v42, %v1946_v63  ;;  %v1970_v59 = vadd.f32 %v2206_v42, %v1947_v60  ;;  %v1971_v25 = vadd.f32 %v2206_v42, %v1948_v37 }
 0x290   : > { %v1972_v54 = vadd.f32 %v2206_v42, %v1949_v19  ;;  %v1973_v1 = vadd.f32 %v2206_v42, %v1950_v3  ;;  %v1974_v35 = vadd.f32 %v2206_v42, %v1951_v6  ;;  %v1975_v11 = vadd.f32 %v2206_v42, %v1952_v9 }
 0x291   : > { %1984 = vst [vmem:[%s3042_s25] sm:$0xff] %v1968_v50  ;;  %1985 = vst [vmem:[%s3042_s25 + $0x8] sm:$0xff] %v1969_v58  ;;  %v1930_v13 = vmul.f32 %v2641_v14, %v3386_v8  ;;  %v1931_v18 = vmul.f32 %v2641_v14, %v3388_v16  ;;  %v1932_v24 = vmul.f32 %v2641_v14, %v3390_v21 }
 0x292   : > { %1986 = vst [vmem:[%s3042_s25 + $0x10] sm:$0xff] %v1970_v59  ;;  %1987 = vst [vmem:[%s3042_s25 + $0x18] sm:$0xff] %v1971_v25  ;;  %v1933_v23 = vmul.f32 %v2641_v14, %v3394_v5  ;;  %v1934_v28 = vmul.f32 %v2641_v14, %v3398_v36  ;;  %v1935_v7 = vmul.f32 %v2641_v14, %v3402_v2 }
 0x293   : > { %1988 = vst [vmem:[%s3042_s25 + $0x20] sm:$0xff] %v1972_v54  ;;  %1989 = vst [vmem:[%s3042_s25 + $0x28] sm:$0xff] %v1973_v1  ;;  %v1936_v33 = vmul.f32 %v2641_v14, %v1880_v4  ;;  %v1937_v0 = vmul.f32 %v2641_v14, %v1881_v17  ;;  %v1953_v29 = vmul.f32 %v2205_v22, %v1930_v13 }
 0x294   : > { %1990 = vst [vmem:[%s3042_s25 + $0x30] sm:$0xff] %v1974_v35  ;;  %1991 = vst [vmem:[%s3042_s25 + $0x38] sm:$0xff] %v1975_v11  ;;  %v1954_v10 = vmul.f32 %v2205_v22, %v1931_v18  ;;  %v1955_v8 = vmul.f32 %v2205_v22, %v1932_v24  ;;  %v1956_v16 = vmul.f32 %v2205_v22, %v1933_v23 }
 0x295   : > { %v1957_v21 = vmul.f32 %v2205_v22, %v1934_v28  ;;  %v1958_v5 = vmul.f32 %v2205_v22, %v1935_v7  ;;  %v1959_v40 = vmul.f32 %v2205_v22, %v1936_v33  ;;  %v1960_v44 = vmul.f32 %v2205_v22, %v1937_v0 }
 0x296   : > { %v1976_v36 = vadd.f32 %v2206_v42, %v1953_v29  ;;  %v1977_v2 = vadd.f32 %v2206_v42, %v1954_v10  ;;  %v1978_v4 = vadd.f32 %v2206_v42, %v1955_v8  ;;  %v1979_v15 = vadd.f32 %v2206_v42, %v1956_v16 }
 0x297   : > { %v1980_v17 = vadd.f32 %v2206_v42, %v1957_v21  ;;  %v1981_v41 = vadd.f32 %v2206_v42, %v1958_v5  ;;  %v1982_v31 = vadd.f32 %v2206_v42, %v1959_v40  ;;  %v1983_v27 = vadd.f32 %v2206_v42, %v1960_v44 }
 0x298   : > { %1992 = vst [vmem:[%s3042_s25 + $0x40] sm:$0xff] %v1976_v36  ;;  %1993 = vst [vmem:[%s3042_s25 + $0x48] sm:$0xff] %v1977_v2 }
 0x299   : > { %1994 = vst [vmem:[%s3042_s25 + $0x50] sm:$0xff] %v1978_v4  ;;  %1995 = vst [vmem:[%s3042_s25 + $0x58] sm:$0xff] %v1979_v15 }
 0x29a   : > { %1996 = vst [vmem:[%s3042_s25 + $0x60] sm:$0xff] %v1980_v17  ;;  %1997 = vst [vmem:[%s3042_s25 + $0x68] sm:$0xff] %v1981_v41 }
 0x29b   : > { %1998 = vst [vmem:[%s3042_s25 + $0x70] sm:$0xff] %v1982_v31  ;;  %1999 = vst [vmem:[%s3042_s25 + $0x78] sm:$0xff] %v1983_v27 }
 0x29c PF: > { %s2208_s13 = sshll.u32 %s2785_s24, 7  ;;  %s2013_s14 = sshll.u32 %s3042_s25, 4  ;;  %s3441_s14 = int_to_ptr.vmem [resolvable:$true] %s2013_s14 }
 0x29d   : > { %s3438_s12 = scalar_lea.hbm %s3496_s5, %s2208_s13  ;;  %s3445_s15 = scalar_lea.sflag [#allocation4], %s671_s28 }
 0x29e   : > { %s2642_s21 = scalar_lea.vmem %s3441_s14, 2048  ;;  %s2720_s24 = smov [#allocation3]  }
 0x29f   : > { %p2643_p6 = scmp.ne.s32.totalorder %s3441_s14, %s2642_s21  ;;  %s2646_s27 = sshll.u32 %s2720_s24, 4  ;;  %s2647_s27 = int_to_ptr.vmem [resolvable:$false] %s2646_s27 }
 0x2a0   : > { %s2648_s29 = scalar_lea.vmem %s2647_s27, 4096  ;;  %p2649_p9 = scmp.lt.s32.totalorder %s3441_s14, %s2647_s27 }
 0x2a1   : > { %p2644_p7 = pnand %p2643_p6, %p2813_p11  ;;  %p2650_p10 = scmp.lt.s32.totalorder %s2648_s29, %s2642_s21 }
 0x2a3   : > { %p2645_p8 = pneg %p2644_p7  ;;  %p2651_p13 = por %p2650_p10, %p2649_p9 }
 0x2a5   : > { %p2652_p0 = pnand %p2651_p13, %p2645_p8 }
 0x2a7   : > { %2655 = shalt.err (!%p2652_p0)
}
 0x2a8   : > { %s2656_s28 = scalar_lea.hbm %s3438_s12, 2048  ;;  %s2660_s17 = scalar_lea.hbm %s3496_s5, 8192 }
 0x2a9   : > { %p2657_p1 = scmp.ne.s32.totalorder %s3438_s12, %s2656_s28  ;;  %p2661_p4 = scmp.lt.s32.totalorder %s3438_s12, %s3496_s5 }
 0x2aa   : > { %p2662_p5 = scmp.lt.s32.totalorder %s2660_s17, %s2656_s28 }
 0x2ab   : > { %p2658_p2 = pnand %p2657_p1, %p2813_p11 }
 0x2ac   : > { %p2663_p6 = por %p2662_p5, %p2661_p4 }
 0x2ad   : > { %p2659_p3 = pneg %p2658_p2 }
 0x2af   : > { %p2664_p7 = pnand %p2663_p6, %p2659_p3 }
 0x2b1   : > { %2667 = shalt.err (!%p2664_p7)
}
 0x2b2   : > { %s2721_s16 = smov 128   ;;  %s2722_s7 = smov 512  }
 0x2b3   : > { %s2723_s21 = smov 8  }
 0x2b4   : > { %2460 = dma.vmem_to_hbm [thread:$0]  (%p2813_p11), %s3441_s14, 2048, %s3438_s12, %s3445_s15, %s2721_s16, %s2722_s7, %s2723_s21  }
 0x2b5 PF: > { %p2466_p8 = scmp.ge.s32.totalorder %s2718_s23, 2  ;;  %s2028_s24 = sand.u32 1, %s2698_s18  }
 0x2b6   : > { %s2029_s27 = scalar_lea.sflag [#allocation4], %s2028_s24 }
 0x2b7   : > { %p2463_p9 = pnand %p2466_p8, %p2817_p12 }
 0x2b9   : > { %p2464_p10 = pneg %p2463_p9 }
 0x2bb   : > { %2693 = dma.done.wait (%p2464_p10), %s2029_s27, 2048  }
 0x2bc   : > { %2695 = vsyncadd (%p2464_p10), %s2029_s27, 4294965248  ;;  %p15_p11 = scmp.ge.s32.totalorder %s2789_s26, 6   ;;  %s3499_s18 = smov %s2702_s19 }
 0x2bd   : > { %s3500_s19 = smov %s2706_s20  ;;  %s3501_s20 = smov %s2806_s9 }
 0x2be   : > { %s3502_s21 = smov %s2714_s22  ;;  %s3503_s22 = smov %s2803_s8 }
 0x2bf   : > { %s3504_s23 = smov %s2789_s26  ;;  %17 = sbr.rel (!%p15_p11) target bundleno = 4 (0x4), region = 135 }
 0x2c4   :  { %2034 = vsyncpa [#allocation4], 1 }
 0x2c5   :  { %2036 = vsyncpa [#allocation4 + $0x1], 1 }

</bundles_post_ra>
